<compile_context>
chip_gen: v7x
topology: tpu7x:2x2x1
jax: 0.10.0
libtpu: 0.0.40
codegen_flags: <defaults>
</compile_context>

<pallas_src>
import jax
import jax.numpy as jnp
from jax.experimental import pallas as pl
from jax.experimental.pallas import tpu as pltpu


# ---------------------------------------------------------------------------
# Pallas kernels
# ---------------------------------------------------------------------------
def _conv_bn_relu_pool_kernel(p_ref, w_ref, b_ref, o_ref):
    """Fused conv (single im2col matmul) + BN-folded bias + ReLU + 2x2 avg pool.

    p_ref : (K, 4*M) -- im2col patches for the four 2x2-pool phases, concatenated
                        along the lane axis (M = B*OH2*OW2 pooled output pixels).
    w_ref : (OC, K)  -- BN-folded conv weight, rows matching the OIHW flatten.
    b_ref : (OC, 1)  -- BN-folded conv bias.
    o_ref : (OC, M)  -- pooled activation, channel-major, columns (b, oh, ow).
    """
    z = jnp.dot(w_ref[...], p_ref[...], preferred_element_type=jnp.float32) + b_ref[...]
    z = jnp.maximum(z, 0.0)                      # ReLU before the pooling average
    m = o_ref.shape[1]
    o_ref[...] = (0.25 * (z[:, 0:m] + z[:, m:2 * m] + z[:, 2 * m:3 * m] + z[:, 3 * m:4 * m])
                  ).astype(o_ref.dtype)


def _conv_pool_mlp_kernel(p_ref, w_ref, b_ref, w3_ref, b0_ref, w1_ref, b1_ref,
                          w2_ref, b2_ref, o_ref):
    """conv2(+BN)+ReLU+avgpool -> flatten -> fc0+ReLU+fc1+ReLU+fc2, fully fused.

    p_ref  : (K2, 4*M2)   layer-1 output im2col phases, M2 = B*5*5.
    w_ref  : (C2, K2)     BN-folded conv2 weight (C2 = 16).
    b_ref  : (C2, 1)
    w3_ref : (C2, HW, D1) fc0 weight split per conv2 channel (HW = 25, D1 = 120);
                          realises PyTorch's (c, h, w) flatten with plain 2D
                          matmuls -- no in-kernel reshape/transpose needed.
    b0_ref : (1, D1); w1_ref : (D1, D2); b1_ref : (1, D2)
    w2_ref : (D2, NC); b2_ref : (1, NC)
    o_ref  : (B, NC)      logits.
    """
    z = jnp.dot(w_ref[...], p_ref[...], preferred_element_type=jnp.float32) + b_ref[...]
    z = jnp.maximum(z, 0.0)
    m2 = z.shape[1] // 4
    pooled = 0.25 * (z[:, 0:m2] + z[:, m2:2 * m2] + z[:, 2 * m2:3 * m2] + z[:, 3 * m2:4 * m2])

    c2, hw, _ = w3_ref.shape
    batch = o_ref.shape[0]
    b0 = b0_ref[...]
    w1 = w1_ref[...]
    b1 = b1_ref[...]
    w2 = w2_ref[...]
    b2 = b2_ref[...]

    # fc0 over the flattened (c, h, w) feature: one small MXU matmul per conv2
    # channel, accumulated in registers. All loops are static (tiny B and C2).
    h_acc = [b0 for _ in range(batch)]
    for c in range(c2):
        w3c = w3_ref[c]                                          # (HW, D1)
        for b in range(batch):
            h_acc[b] = h_acc[b] + jnp.dot(
                pooled[c:c + 1, b * hw:(b + 1) * hw], w3c,
                preferred_element_type=jnp.float32)
    # TODO(synk): at large batch the fc1/fc2 tail should be batched instead of
    # per-sample (and the kernel tiled over a "parallel" M/batch grid axis).
    for b in range(batch):
        h = jnp.maximum(h_acc[b], 0.0)
        h = jnp.maximum(jnp.dot(h, w1, preferred_element_type=jnp.float32) + b1, 0.0)
        out = jnp.dot(h, w2, preferred_element_type=jnp.float32) + b2
        o_ref[b:b + 1, :] = out.astype(o_ref.dtype)


# ---------------------------------------------------------------------------
# Pallas wrappers (grid-less, whole-array VMEM residency)
# ---------------------------------------------------------------------------
_VMEM_SPEC = pl.BlockSpec(memory_space=pltpu.MemorySpace.VMEM)


def conv_bn_relu_pool(phases, w, b):
    """phases: (K, 4*M); w: (OC, K); b: (OC, 1) -> (OC, M)."""
    _, m4 = phases.shape
    oc = w.shape[0]
    return pl.pallas_call(
        _conv_bn_relu_pool_kernel,
        out_shape=jax.ShapeDtypeStruct((oc, m4 // 4), jnp.float32),
        in_specs=[_VMEM_SPEC] * 3,
        out_specs=_VMEM_SPEC,
    )(phases, w, b)


def conv_pool_mlp_head(phases, w, b, w3, b0, w1, b1, w2, b2, batch):
    """Fused layer2 + flatten + MLP head. Returns (batch, num_classes) logits."""
    num_classes = w2.shape[1]
    return pl.pallas_call(
        _conv_pool_mlp_kernel,
        out_shape=jax.ShapeDtypeStruct((batch, num_classes), jnp.float32),
        in_specs=[_VMEM_SPEC] * 9,
        out_specs=_VMEM_SPEC,
    )(phases, w, b, w3, b0, w1, b1, w2, b2)


# ---------------------------------------------------------------------------
# Glue: pooled-phase im2col (pure index shuffling, no FLOPs, channel-major)
# ---------------------------------------------------------------------------
def _phase_im2col(a, kh, kw):
    """a: (C, B, H, W) channel-major -> ((C*kh*kw, 4*B*OH2*OW2), OH2, OW2).

    Rows ordered (c, ki, kj) to match the OIHW weight flatten; the four 2x2-pool
    phase blocks are concatenated along columns, each block ordered (b, oh, ow).
    Conv output spatial dims (H-kh+1, W-kw+1) must be even (true for 32->28 and
    14->10). TODO(synk): other input sizes would need ragged/padded pooling.
    """
    C, B, H, W = a.shape
    oh, ow = H - kh + 1, W - kw + 1
    oh2, ow2 = oh // 2, ow // 2
    K = C * kh * kw
    slabs = [a[:, :, i:i + oh, j:j + ow] for i in range(kh) for j in range(kw)]
    p = jnp.stack(slabs, axis=1).reshape(K, B, oh, ow)           # rows (c, ki, kj)
    phases = [p[:, :, ph::2, pw::2].reshape(K, B * oh2 * ow2)
              for ph in range(2) for pw in range(2)]
    return jnp.concatenate(phases, axis=1), oh2, ow2


# ---------------------------------------------------------------------------
# Parameters
# ---------------------------------------------------------------------------
def init_lenet_params(key, num_classes=10, n_input_channels=1):
    ks = jax.random.split(key, 10)
    s = 0.1
    f32 = jnp.float32
    return {
        "conv1_w": s * jax.random.normal(ks[0], (6, n_input_channels, 5, 5), f32),
        "conv1_b": s * jax.random.normal(ks[1], (6,), f32),
        "bn1_gamma": jnp.ones((6,), f32),
        "bn1_beta": jnp.zeros((6,), f32),
        "bn1_mean": jnp.zeros((6,), f32),
        "bn1_var": jnp.ones((6,), f32),
        "conv2_w": s * jax.random.normal(ks[2], (16, 6, 5, 5), f32),
        "conv2_b": s * jax.random.normal(ks[3], (16,), f32),
        "bn2_gamma": jnp.ones((16,), f32),
        "bn2_beta": jnp.zeros((16,), f32),
        "bn2_mean": jnp.zeros((16,), f32),
        "bn2_var": jnp.ones((16,), f32),
        "fc0_w": s * jax.random.normal(ks[4], (120, 400), f32),
        "fc0_b": s * jax.random.normal(ks[5], (120,), f32),
        "fc1_w": s * jax.random.normal(ks[6], (84, 120), f32),
        "fc1_b": s * jax.random.normal(ks[7], (84,), f32),
        "fc2_w": s * jax.random.normal(ks[8], (num_classes, 84), f32),
        "fc2_b": s * jax.random.normal(ks[9], (num_classes,), f32),
    }


def prepare_params(params, bn_eps=1e-5):
    """Fold eval-mode BatchNorm into the conv weights/bias and pre-layout every
    weight into the exact shape the Pallas kernels consume. Done once, outside jit.
    TODO(synk): training-mode BatchNorm (batch stats + running-stat updates) is
    not implemented; only eval-mode running-stat folding."""
    def fold(w, b, gamma, beta, mean, var):
        scale = gamma / jnp.sqrt(var + bn_eps)                          # (OC,)
        w_f = (w * scale[:, None, None, None]).reshape(w.shape[0], -1)  # (OC, IC*KH*KW)
        b_f = ((b - mean) * scale + beta)[:, None]                      # (OC, 1)
        return w_f, b_f

    c1w, c1b = fold(params["conv1_w"], params["conv1_b"], params["bn1_gamma"],
                    params["bn1_beta"], params["bn1_mean"], params["bn1_var"])
    c2w, c2b = fold(params["conv2_w"], params["conv2_b"], params["bn2_gamma"],
                    params["bn2_beta"], params["bn2_mean"], params["bn2_var"])

    oc2 = params["conv2_w"].shape[0]                 # 16
    d1, feat = params["fc0_w"].shape                 # 120, 400
    hw2 = feat // oc2                                # 25 (= 5*5 pooled conv2 output)
    # fc0_w3[c, hw, j] = fc0_w[j, c*hw2 + hw]  -> per-channel flatten/fc0 fusion
    fc0_w3 = params["fc0_w"].reshape(d1, oc2, hw2).transpose(1, 2, 0)   # (16, 25, 120)

    return {
        "conv1_w": c1w, "conv1_b": c1b,
        "conv2_w": c2w, "conv2_b": c2b,
        "fc0_w3": fc0_w3, "fc0_b": params["fc0_b"][None, :],
        "fc1_w": params["fc1_w"].T, "fc1_b": params["fc1_b"][None, :],
        "fc2_w": params["fc2_w"].T, "fc2_b": params["fc2_b"][None, :],
    }


# ---------------------------------------------------------------------------
# LeNet5 forward (matches the PyTorch module's forward, eval mode)
# ---------------------------------------------------------------------------
def lenet_forward(prepared, x, n_input_padding=2):
    B = x.shape[0]
    if n_input_padding > 0:
        p = n_input_padding
        x = jnp.pad(x, ((0, 0), (0, 0), (p, p), (p, p)))
    x_cm = jnp.transpose(x, (1, 0, 2, 3))                # channel-major (C, B, H, W)

    # layer1: conv1 + BN + ReLU + avgpool(2,2)   -> fused kernel A (one matmul)
    phases1, oh1, ow1 = _phase_im2col(x_cm, 5, 5)        # (25, 4*B*14*14)
    a1 = conv_bn_relu_pool(phases1, prepared["conv1_w"], prepared["conv1_b"])  # (6, B*196)
    a1 = a1.reshape(a1.shape[0], B, oh1, ow1)            # free reshape, stays channel-major

    # layer2 + flatten + fc0/ReLU/fc1/ReLU/fc2   -> fused kernel B
    phases2, _, _ = _phase_im2col(a1, 5, 5)              # (150, 4*B*25)
    return conv_pool_mlp_head(phases2, prepared["conv2_w"], prepared["conv2_b"],
                              prepared["fc0_w3"], prepared["fc0_b"],
                              prepared["fc1_w"], prepared["fc1_b"],
                              prepared["fc2_w"], prepared["fc2_b"], B)


# ---------------------------------------------------------------------------
# Pure-JAX reference (for a correctness cross-check against the Pallas path)
# ---------------------------------------------------------------------------
def lenet_reference(params, x, n_input_padding=2, bn_eps=1e-5):
    def block(x, w, b, gamma, beta, mean, var, padding):
        y = jax.lax.conv_general_dilated(
            x, w, window_strides=(1, 1),
            padding=[(padding, padding), (padding, padding)],
            dimension_numbers=("NCHW", "OIHW", "NCHW"))
        y = y + b[None, :, None, None]
        scale = gamma / jnp.sqrt(var + bn_eps)
        y = (y - mean[None, :, None, None]) * scale[None, :, None, None] \
            + beta[None, :, None, None]
        y = jnp.maximum(y, 0.0)
        y = jax.lax.reduce_window(y, 0.0, jax.lax.add,
                                  (1, 1, 2, 2), (1, 1, 2, 2), "VALID") * 0.25
        return y

    y = block(x, params["conv1_w"], params["conv1_b"], params["bn1_gamma"],
              params["bn1_beta"], params["bn1_mean"], params["bn1_var"], n_input_padding)
    y = block(y, params["conv2_w"], params["conv2_b"], params["bn2_gamma"],
              params["bn2_beta"], params["bn2_mean"], params["bn2_var"], 0)
    f = y.reshape(y.shape[0], -1)
    f = jnp.maximum(f @ params["fc0_w"].T + params["fc0_b"], 0.0)
    f = jnp.maximum(f @ params["fc1_w"].T + params["fc1_b"], 0.0)
    return f @ params["fc2_w"].T + params["fc2_b"]


if __name__ == "__main__":
    key = jax.random.PRNGKey(0)
    k_param, k_x = jax.random.split(key)
    params = init_lenet_params(k_param, num_classes=10, n_input_channels=1)
    prepared = prepare_params(params)

    # Canonical LeNet input: batch=2, 1 channel, 28x28 (padding=2 -> 32x32 effective).
    x = jax.random.normal(k_x, (2, 1, 28, 28), jnp.float32)

    fwd = jax.jit(lenet_forward)
    out = jax.block_until_ready(fwd(prepared, x))
    assert out.shape == (2, 10), out.shape
    assert bool(jnp.all(jnp.isfinite(out)))

    with jax.default_matmul_precision("highest"):
        ref = jax.block_until_ready(jax.jit(lenet_reference)(params, x))
    assert bool(jnp.allclose(out, ref, rtol=2e-2, atol=2e-3)), \
        float(jnp.max(jnp.abs(out - ref)))

    print("KERNEL_OK")
</pallas_src>

<mosaic_0001>
module attributes {stable_mosaic.version = 11 : i64} {
  func.func @_conv_bn_relu_pool_kernel(%arg0: memref<25x1568xf32, #tpu.memory_space<vmem>>, %arg1: memref<6x25xf32, #tpu.memory_space<vmem>>, %arg2: memref<6x1xf32, #tpu.memory_space<vmem>>, %arg3: memref<6x392xf32, #tpu.memory_space<vmem>>) attributes {dimension_semantics = [], scalar_prefetch = 0 : i64, scratch_operands = 0 : i64, tpu.core_type = #tpu.core_type<tc>} {
    %c0 = arith.constant 0 : index
    %c0_0 = arith.constant 0 : index
    %0 = vector.load %arg1[%c0, %c0_0] : memref<6x25xf32, #tpu.memory_space<vmem>>, vector<6x25xf32>
    %c0_1 = arith.constant 0 : index
    %c0_2 = arith.constant 0 : index
    %1 = vector.load %arg0[%c0_1, %c0_2] : memref<25x1568xf32, #tpu.memory_space<vmem>>, vector<25x1568xf32>
    %cst = arith.constant dense<0.000000e+00> : vector<6x1568xf32>
    %2 = tpu.matmul %0, %1, %cst {dimension_numbers = #tpu.dot_dimension_numbers<[1], [0], [0], [1], [0, 0, 1, 1], [], []>} : vector<6x25xf32>, vector<25x1568xf32>, vector<6x1568xf32> -> vector<6x1568xf32>
    %c0_3 = arith.constant 0 : index
    %c0_4 = arith.constant 0 : index
    %3 = vector.load %arg2[%c0_3, %c0_4] : memref<6x1xf32, #tpu.memory_space<vmem>>, vector<6x1xf32>
    %4 = vector.broadcast %3 : vector<6x1xf32> to vector<6x1568xf32>
    %5 = arith.addf %2, %4 : vector<6x1568xf32>
    %cst_5 = arith.constant 0.000000e+00 : f32
    %6 = vector.broadcast %cst_5 : f32 to vector<6x1568xf32>
    %7 = arith.maximumf %5, %6 : vector<6x1568xf32>
    %8 = vector.extract_strided_slice %7 {offsets = [0, 0], sizes = [6, 392], strides = [1, 1]} : vector<6x1568xf32> to vector<6x392xf32>
    %9 = vector.extract_strided_slice %7 {offsets = [0, 392], sizes = [6, 392], strides = [1, 1]} : vector<6x1568xf32> to vector<6x392xf32>
    %10 = arith.addf %8, %9 : vector<6x392xf32>
    %11 = vector.extract_strided_slice %7 {offsets = [0, 784], sizes = [6, 392], strides = [1, 1]} : vector<6x1568xf32> to vector<6x392xf32>
    %12 = arith.addf %10, %11 : vector<6x392xf32>
    %13 = vector.extract_strided_slice %7 {offsets = [0, 1176], sizes = [6, 392], strides = [1, 1]} : vector<6x1568xf32> to vector<6x392xf32>
    %14 = arith.addf %12, %13 : vector<6x392xf32>
    %cst_6 = arith.constant 2.500000e-01 : f32
    %15 = vector.broadcast %cst_6 : f32 to vector<6x392xf32>
    %16 = arith.mulf %15, %14 : vector<6x392xf32>
    %c0_7 = arith.constant 0 : index
    %c0_8 = arith.constant 0 : index
    %17 = vector.load %arg3[%c0_7, %c0_8] : memref<6x392xf32, #tpu.memory_space<vmem>>, vector<6x392xf32>
    tpu.vector_store %arg3[%c0_7, %c0_8], %16 {strides = array<i32>} : memref<6x392xf32, #tpu.memory_space<vmem>>, vector<6x392xf32>,
    return
  }
}

module attributes {stable_mosaic.version = 11 : i64} {
  func.func @_conv_pool_mlp_kernel(%arg0: memref<150x200xf32, #tpu.memory_space<vmem>>, %arg1: memref<16x150xf32, #tpu.memory_space<vmem>>, %arg2: memref<16x1xf32, #tpu.memory_space<vmem>>, %arg3: memref<16x25x120xf32, #tpu.memory_space<vmem>>, %arg4: memref<1x120xf32, #tpu.memory_space<vmem>>, %arg5: memref<120x84xf32, #tpu.memory_space<vmem>>, %arg6: memref<1x84xf32, #tpu.memory_space<vmem>>, %arg7: memref<84x10xf32, #tpu.memory_space<vmem>>, %arg8: memref<1x10xf32, #tpu.memory_space<vmem>>, %arg9: memref<2x10xf32, #tpu.memory_space<vmem>>) attributes {dimension_semantics = [], scalar_prefetch = 0 : i64, scratch_operands = 0 : i64, tpu.core_type = #tpu.core_type<tc>} {
    %c0 = arith.constant 0 : index
    %c0_0 = arith.constant 0 : index
    %0 = vector.load %arg1[%c0, %c0_0] : memref<16x150xf32, #tpu.memory_space<vmem>>, vector<16x150xf32>
    %c0_1 = arith.constant 0 : index
    %c0_2 = arith.constant 0 : index
    %1 = vector.load %arg0[%c0_1, %c0_2] : memref<150x200xf32, #tpu.memory_space<vmem>>, vector<150x200xf32>
    %cst = arith.constant dense<0.000000e+00> : vector<16x200xf32>
    %2 = tpu.matmul %0, %1, %cst {dimension_numbers = #tpu.dot_dimension_numbers<[1], [0], [0], [1], [0, 0, 1, 1], [], []>} : vector<16x150xf32>, vector<150x200xf32>, vector<16x200xf32> -> vector<16x200xf32>
    %c0_3 = arith.constant 0 : index
    %c0_4 = arith.constant 0 : index
    %3 = vector.load %arg2[%c0_3, %c0_4] : memref<16x1xf32, #tpu.memory_space<vmem>>, vector<16x1xf32>
    %4 = vector.broadcast %3 : vector<16x1xf32> to vector<16x200xf32>
    %5 = arith.addf %2, %4 : vector<16x200xf32>
    %cst_5 = arith.constant 0.000000e+00 : f32
    %6 = vector.broadcast %cst_5 : f32 to vector<16x200xf32>
    %7 = arith.maximumf %5, %6 : vector<16x200xf32>
    %8 = vector.extract_strided_slice %7 {offsets = [0, 0], sizes = [16, 50], strides = [1, 1]} : vector<16x200xf32> to vector<16x50xf32>
    %9 = vector.extract_strided_slice %7 {offsets = [0, 50], sizes = [16, 50], strides = [1, 1]} : vector<16x200xf32> to vector<16x50xf32>
    %10 = arith.addf %8, %9 : vector<16x50xf32>
    %11 = vector.extract_strided_slice %7 {offsets = [0, 100], sizes = [16, 50], strides = [1, 1]} : vector<16x200xf32> to vector<16x50xf32>
    %12 = arith.addf %10, %11 : vector<16x50xf32>
    %13 = vector.extract_strided_slice %7 {offsets = [0, 150], sizes = [16, 50], strides = [1, 1]} : vector<16x200xf32> to vector<16x50xf32>
    %14 = arith.addf %12, %13 : vector<16x50xf32>
    %cst_6 = arith.constant 2.500000e-01 : f32
    %15 = vector.broadcast %cst_6 : f32 to vector<16x50xf32>
    %16 = arith.mulf %15, %14 : vector<16x50xf32>
    %c0_7 = arith.constant 0 : index
    %c0_8 = arith.constant 0 : index
    %17 = vector.load %arg4[%c0_7, %c0_8] : memref<1x120xf32, #tpu.memory_space<vmem>>, vector<1x120xf32>
    %c0_9 = arith.constant 0 : index
    %c0_10 = arith.constant 0 : index
    %18 = vector.load %arg5[%c0_9, %c0_10] : memref<120x84xf32, #tpu.memory_space<vmem>>, vector<120x84xf32>
    %c0_11 = arith.constant 0 : index
    %c0_12 = arith.constant 0 : index
    %19 = vector.load %arg6[%c0_11, %c0_12] : memref<1x84xf32, #tpu.memory_space<vmem>>, vector<1x84xf32>
    %c0_13 = arith.constant 0 : index
    %c0_14 = arith.constant 0 : index
    %20 = vector.load %arg7[%c0_13, %c0_14] : memref<84x10xf32, #tpu.memory_space<vmem>>, vector<84x10xf32>
    %c0_15 = arith.constant 0 : index
    %c0_16 = arith.constant 0 : index
    %21 = vector.load %arg8[%c0_15, %c0_16] : memref<1x10xf32, #tpu.memory_space<vmem>>, vector<1x10xf32>
    %c0_17 = arith.constant 0 : index
    %c0_18 = arith.constant 0 : index
    %c0_19 = arith.constant 0 : index
    %22 = vector.load %arg3[%c0_17, %c0_18, %c0_19] : memref<16x25x120xf32, #tpu.memory_space<vmem>>, vector<1x25x120xf32>
    %23 = vector.shape_cast %22 : vector<1x25x120xf32> to vector<25x120xf32>
    %24 = vector.extract_strided_slice %16 {offsets = [0, 0], sizes = [1, 25], strides = [1, 1]} : vector<16x50xf32> to vector<1x25xf32>
    %cst_20 = arith.constant dense<0.000000e+00> : vector<1x120xf32>
    %25 = tpu.matmul %24, %23, %cst_20 {dimension_numbers = #tpu.dot_dimension_numbers<[1], [0], [0], [1], [0, 0, 1, 1], [], []>} : vector<1x25xf32>, vector<25x120xf32>, vector<1x120xf32> -> vector<1x120xf32>
    %26 = arith.addf %17, %25 : vector<1x120xf32>
    %27 = vector.extract_strided_slice %16 {offsets = [0, 25], sizes = [1, 25], strides = [1, 1]} : vector<16x50xf32> to vector<1x25xf32>
    %cst_21 = arith.constant dense<0.000000e+00> : vector<1x120xf32>
    %28 = tpu.matmul %27, %23, %cst_21 {dimension_numbers = #tpu.dot_dimension_numbers<[1], [0], [0], [1], [0, 0, 1, 1], [], []>} : vector<1x25xf32>, vector<25x120xf32>, vector<1x120xf32> -> vector<1x120xf32>
    %29 = arith.addf %17, %28 : vector<1x120xf32>
    %c1 = arith.constant 1 : index
    %c0_22 = arith.constant 0 : index
    %c0_23 = arith.constant 0 : index
    %30 = vector.load %arg3[%c1, %c0_22, %c0_23] : memref<16x25x120xf32, #tpu.memory_space<vmem>>, vector<1x25x120xf32>
    %31 = vector.shape_cast %30 : vector<1x25x120xf32> to vector<25x120xf32>
    %32 = vector.extract_strided_slice %16 {offsets = [1, 0], sizes = [1, 25], strides = [1, 1]} : vector<16x50xf32> to vector<1x25xf32>
    %cst_24 = arith.constant dense<0.000000e+00> : vector<1x120xf32>
    %33 = tpu.matmul %32, %31, %cst_24 {dimension_numbers = #tpu.dot_dimension_numbers<[1], [0], [0], [1], [0, 0, 1, 1], [], []>} : vector<1x25xf32>, vector<25x120xf32>, vector<1x120xf32> -> vector<1x120xf32>
    %34 = arith.addf %26, %33 : vector<1x120xf32>
    %35 = vector.extract_strided_slice %16 {offsets = [1, 25], sizes = [1, 25], strides = [1, 1]} : vector<16x50xf32> to vector<1x25xf32>
    %cst_25 = arith.constant dense<0.000000e+00> : vector<1x120xf32>
    %36 = tpu.matmul %35, %31, %cst_25 {dimension_numbers = #tpu.dot_dimension_numbers<[1], [0], [0], [1], [0, 0, 1, 1], [], []>} : vector<1x25xf32>, vector<25x120xf32>, vector<1x120xf32> -> vector<1x120xf32>
    %37 = arith.addf %29, %36 : vector<1x120xf32>
    %c2 = arith.constant 2 : index
    %c0_26 = arith.constant 0 : index
    %c0_27 = arith.constant 0 : index
    %38 = vector.load %arg3[%c2, %c0_26, %c0_27] : memref<16x25x120xf32, #tpu.memory_space<vmem>>, vector<1x25x120xf32>
    %39 = vector.shape_cast %38 : vector<1x25x120xf32> to vector<25x120xf32>
    %40 = vector.extract_strided_slice %16 {offsets = [2, 0], sizes = [1, 25], strides = [1, 1]} : vector<16x50xf32> to vector<1x25xf32>
    %cst_28 = arith.constant dense<0.000000e+00> : vector<1x120xf32>
    %41 = tpu.matmul %40, %39, %cst_28 {dimension_numbers = #tpu.dot_dimension_numbers<[1], [0], [0], [1], [0, 0, 1, 1], [], []>} : vector<1x25xf32>, vector<25x120xf32>, vector<1x120xf32> -> vector<1x120xf32>
    %42 = arith.addf %34, %41 : vector<1x120xf32>
    %43 = vector.extract_strided_slice %16 {offsets = [2, 25], sizes = [1, 25], strides = [1, 1]} : vector<16x50xf32> to vector<1x25xf32>
    %cst_29 = arith.constant dense<0.000000e+00> : vector<1x120xf32>
    %44 = tpu.matmul %43, %39, %cst_29 {dimension_numbers = #tpu.dot_dimension_numbers<[1], [0], [0], [1], [0, 0, 1, 1], [], []>} : vector<1x25xf32>, vector<25x120xf32>, vector<1x120xf32> -> vector<1x120xf32>
    %45 = arith.addf %37, %44 : vector<1x120xf32>
    %c3 = arith.constant 3 : index
    %c0_30 = arith.constant 0 : index
    %c0_31 = arith.constant 0 : index
    %46 = vector.load %arg3[%c3, %c0_30, %c0_31] : memref<16x25x120xf32, #tpu.memory_space<vmem>>, vector<1x25x120xf32>
    %47 = vector.shape_cast %46 : vector<1x25x120xf32> to vector<25x120xf32>
    %48 = vector.extract_strided_slice %16 {offsets = [3, 0], sizes = [1, 25], strides = [1, 1]} : vector<16x50xf32> to vector<1x25xf32>
    %cst_32 = arith.constant dense<0.000000e+00> : vector<1x120xf32>
    %49 = tpu.matmul %48, %47, %cst_32 {dimension_numbers = #tpu.dot_dimension_numbers<[1], [0], [0], [1], [0, 0, 1, 1], [], []>} : vector<1x25xf32>, vector<25x120xf32>, vector<1x120xf32> -> vector<1x120xf32>
    %50 = arith.addf %42, %49 : vector<1x120xf32>
    %51 = vector.extract_strided_slice %16 {offsets = [3, 25], sizes = [1, 25], strides = [1, 1]} : vector<16x50xf32> to vector<1x25xf32>
    %cst_33 = arith.constant dense<0.000000e+00> : vector<1x120xf32>
    %52 = tpu.matmul %51, %47, %cst_33 {dimension_numbers = #tpu.dot_dimension_numbers<[1], [0], [0], [1], [0, 0, 1, 1], [], []>} : vector<1x25xf32>, vector<25x120xf32>, vector<1x120xf32> -> vector<1x120xf32>
    %53 = arith.addf %45, %52 : vector<1x120xf32>
    %c4 = arith.constant 4 : index
    %c0_34 = arith.constant 0 : index
    %c0_35 = arith.constant 0 : index
    %54 = vector.load %arg3[%c4, %c0_34, %c0_35] : memref<16x25x120xf32, #tpu.memory_space<vmem>>, vector<1x25x120xf32>
    %55 = vector.shape_cast %54 : vector<1x25x120xf32> to vector<25x120xf32>
    %56 = vector.extract_strided_slice %16 {offsets = [4, 0], sizes = [1, 25], strides = [1, 1]} : vector<16x50xf32> to vector<1x25xf32>
    %cst_36 = arith.constant dense<0.000000e+00> : vector<1x120xf32>
    %57 = tpu.matmul %56, %55, %cst_36 {dimension_numbers = #tpu.dot_dimension_numbers<[1], [0], [0], [1], [0, 0, 1, 1], [], []>} : vector<1x25xf32>, vector<25x120xf32>, vector<1x120xf32> -> vector<1x120xf32>
    %58 = arith.addf %50, %57 : vector<1x120xf32>
    %59 = vector.extract_strided_slice %16 {offsets = [4, 25], sizes = [1, 25], strides = [1, 1]} : vector<16x50xf32> to vector<1x25xf32>
    %cst_37 = arith.constant dense<0.000000e+00> : vector<1x120xf32>
    %60 = tpu.matmul %59, %55, %cst_37 {dimension_numbers = #tpu.dot_dimension_numbers<[1], [0], [0], [1], [0, 0, 1, 1], [], []>} : vector<1x25xf32>, vector<25x120xf32>, vector<1x120xf32> -> vector<1x120xf32>
    %61 = arith.addf %53, %60 : vector<1x120xf32>
    %c5 = arith.constant 5 : index
    %c0_38 = arith.constant 0 : index
    %c0_39 = arith.constant 0 : index
    %62 = vector.load %arg3[%c5, %c0_38, %c0_39] : memref<16x25x120xf32, #tpu.memory_space<vmem>>, vector<1x25x120xf32>
    %63 = vector.shape_cast %62 : vector<1x25x120xf32> to vector<25x120xf32>
    %64 = vector.extract_strided_slice %16 {offsets = [5, 0], sizes = [1, 25], strides = [1, 1]} : vector<16x50xf32> to vector<1x25xf32>
    %cst_40 = arith.constant dense<0.000000e+00> : vector<1x120xf32>
    %65 = tpu.matmul %64, %63, %cst_40 {dimension_numbers = #tpu.dot_dimension_numbers<[1], [0], [0], [1], [0, 0, 1, 1], [], []>} : vector<1x25xf32>, vector<25x120xf32>, vector<1x120xf32> -> vector<1x120xf32>
    %66 = arith.addf %58, %65 : vector<1x120xf32>
    %67 = vector.extract_strided_slice %16 {offsets = [5, 25], sizes = [1, 25], strides = [1, 1]} : vector<16x50xf32> to vector<1x25xf32>
    %cst_41 = arith.constant dense<0.000000e+00> : vector<1x120xf32>
    %68 = tpu.matmul %67, %63, %cst_41 {dimension_numbers = #tpu.dot_dimension_numbers<[1], [0], [0], [1], [0, 0, 1, 1], [], []>} : vector<1x25xf32>, vector<25x120xf32>, vector<1x120xf32> -> vector<1x120xf32>
    %69 = arith.addf %61, %68 : vector<1x120xf32>
    %c6 = arith.constant 6 : index
    %c0_42 = arith.constant 0 : index
    %c0_43 = arith.constant 0 : index
    %70 = vector.load %arg3[%c6, %c0_42, %c0_43] : memref<16x25x120xf32, #tpu.memory_space<vmem>>, vector<1x25x120xf32>
    %71 = vector.shape_cast %70 : vector<1x25x120xf32> to vector<25x120xf32>
    %72 = vector.extract_strided_slice %16 {offsets = [6, 0], sizes = [1, 25], strides = [1, 1]} : vector<16x50xf32> to vector<1x25xf32>
    %cst_44 = arith.constant dense<0.000000e+00> : vector<1x120xf32>
    %73 = tpu.matmul %72, %71, %cst_44 {dimension_numbers = #tpu.dot_dimension_numbers<[1], [0], [0], [1], [0, 0, 1, 1], [], []>} : vector<1x25xf32>, vector<25x120xf32>, vector<1x120xf32> -> vector<1x120xf32>
    %74 = arith.addf %66, %73 : vector<1x120xf32>
    %75 = vector.extract_strided_slice %16 {offsets = [6, 25], sizes = [1, 25], strides = [1, 1]} : vector<16x50xf32> to vector<1x25xf32>
    %cst_45 = arith.constant dense<0.000000e+00> : vector<1x120xf32>
    %76 = tpu.matmul %75, %71, %cst_45 {dimension_numbers = #tpu.dot_dimension_numbers<[1], [0], [0], [1], [0, 0, 1, 1], [], []>} : vector<1x25xf32>, vector<25x120xf32>, vector<1x120xf32> -> vector<1x120xf32>
    %77 = arith.addf %69, %76 : vector<1x120xf32>
    %c7 = arith.constant 7 : index
    %c0_46 = arith.constant 0 : index
    %c0_47 = arith.constant 0 : index
    %78 = vector.load %arg3[%c7, %c0_46, %c0_47] : memref<16x25x120xf32, #tpu.memory_space<vmem>>, vector<1x25x120xf32>
    %79 = vector.shape_cast %78 : vector<1x25x120xf32> to vector<25x120xf32>
    %80 = vector.extract_strided_slice %16 {offsets = [7, 0], sizes = [1, 25], strides = [1, 1]} : vector<16x50xf32> to vector<1x25xf32>
    %cst_48 = arith.constant dense<0.000000e+00> : vector<1x120xf32>
    %81 = tpu.matmul %80, %79, %cst_48 {dimension_numbers = #tpu.dot_dimension_numbers<[1], [0], [0], [1], [0, 0, 1, 1], [], []>} : vector<1x25xf32>, vector<25x120xf32>, vector<1x120xf32> -> vector<1x120xf32>
    %82 = arith.addf %74, %81 : vector<1x120xf32>
    %83 = vector.extract_strided_slice %16 {offsets = [7, 25], sizes = [1, 25], strides = [1, 1]} : vector<16x50xf32> to vector<1x25xf32>
    %cst_49 = arith.constant dense<0.000000e+00> : vector<1x120xf32>
    %84 = tpu.matmul %83, %79, %cst_49 {dimension_numbers = #tpu.dot_dimension_numbers<[1], [0], [0], [1], [0, 0, 1, 1], [], []>} : vector<1x25xf32>, vector<25x120xf32>, vector<1x120xf32> -> vector<1x120xf32>
    %85 = arith.addf %77, %84 : vector<1x120xf32>
    %c8 = arith.constant 8 : index
    %c0_50 = arith.constant 0 : index
    %c0_51 = arith.constant 0 : index
    %86 = vector.load %arg3[%c8, %c0_50, %c0_51] : memref<16x25x120xf32, #tpu.memory_space<vmem>>, vector<1x25x120xf32>
    %87 = vector.shape_cast %86 : vector<1x25x120xf32> to vector<25x120xf32>
    %88 = vector.extract_strided_slice %16 {offsets = [8, 0], sizes = [1, 25], strides = [1, 1]} : vector<16x50xf32> to vector<1x25xf32>
    %cst_52 = arith.constant dense<0.000000e+00> : vector<1x120xf32>
    %89 = tpu.matmul %88, %87, %cst_52 {dimension_numbers = #tpu.dot_dimension_numbers<[1], [0], [0], [1], [0, 0, 1, 1], [], []>} : vector<1x25xf32>, vector<25x120xf32>, vector<1x120xf32> -> vector<1x120xf32>
    %90 = arith.addf %82, %89 : vector<1x120xf32>
    %91 = vector.extract_strided_slice %16 {offsets = [8, 25], sizes = [1, 25], strides = [1, 1]} : vector<16x50xf32> to vector<1x25xf32>
    %cst_53 = arith.constant dense<0.000000e+00> : vector<1x120xf32>
    %92 = tpu.matmul %91, %87, %cst_53 {dimension_numbers = #tpu.dot_dimension_numbers<[1], [0], [0], [1], [0, 0, 1, 1], [], []>} : vector<1x25xf32>, vector<25x120xf32>, vector<1x120xf32> -> vector<1x120xf32>
    %93 = arith.addf %85, %92 : vector<1x120xf32>
    %c9 = arith.constant 9 : index
    %c0_54 = arith.constant 0 : index
    %c0_55 = arith.constant 0 : index
    %94 = vector.load %arg3[%c9, %c0_54, %c0_55] : memref<16x25x120xf32, #tpu.memory_space<vmem>>, vector<1x25x120xf32>
    %95 = vector.shape_cast %94 : vector<1x25x120xf32> to vector<25x120xf32>
    %96 = vector.extract_strided_slice %16 {offsets = [9, 0], sizes = [1, 25], strides = [1, 1]} : vector<16x50xf32> to vector<1x25xf32>
    %cst_56 = arith.constant dense<0.000000e+00> : vector<1x120xf32>
    %97 = tpu.matmul %96, %95, %cst_56 {dimension_numbers = #tpu.dot_dimension_numbers<[1], [0], [0], [1], [0, 0, 1, 1], [], []>} : vector<1x25xf32>, vector<25x120xf32>, vector<1x120xf32> -> vector<1x120xf32>
    %98 = arith.addf %90, %97 : vector<1x120xf32>
    %99 = vector.extract_strided_slice %16 {offsets = [9, 25], sizes = [1, 25], strides = [1, 1]} : vector<16x50xf32> to vector<1x25xf32>
    %cst_57 = arith.constant dense<0.000000e+00> : vector<1x120xf32>
    %100 = tpu.matmul %99, %95, %cst_57 {dimension_numbers = #tpu.dot_dimension_numbers<[1], [0], [0], [1], [0, 0, 1, 1], [], []>} : vector<1x25xf32>, vector<25x120xf32>, vector<1x120xf32> -> vector<1x120xf32>
    %101 = arith.addf %93, %100 : vector<1x120xf32>
    %c10 = arith.constant 10 : index
    %c0_58 = arith.constant 0 : index
    %c0_59 = arith.constant 0 : index
    %102 = vector.load %arg3[%c10, %c0_58, %c0_59] : memref<16x25x120xf32, #tpu.memory_space<vmem>>, vector<1x25x120xf32>
    %103 = vector.shape_cast %102 : vector<1x25x120xf32> to vector<25x120xf32>
    %104 = vector.extract_strided_slice %16 {offsets = [10, 0], sizes = [1, 25], strides = [1, 1]} : vector<16x50xf32> to vector<1x25xf32>
    %cst_60 = arith.constant dense<0.000000e+00> : vector<1x120xf32>
    %105 = tpu.matmul %104, %103, %cst_60 {dimension_numbers = #tpu.dot_dimension_numbers<[1], [0], [0], [1], [0, 0, 1, 1], [], []>} : vector<1x25xf32>, vector<25x120xf32>, vector<1x120xf32> -> vector<1x120xf32>
    %106 = arith.addf %98, %105 : vector<1x120xf32>
    %107 = vector.extract_strided_slice %16 {offsets = [10, 25], sizes = [1, 25], strides = [1, 1]} : vector<16x50xf32> to vector<1x25xf32>
    %cst_61 = arith.constant dense<0.000000e+00> : vector<1x120xf32>
    %108 = tpu.matmul %107, %103, %cst_61 {dimension_numbers = #tpu.dot_dimension_numbers<[1], [0], [0], [1], [0, 0, 1, 1], [], []>} : vector<1x25xf32>, vector<25x120xf32>, vector<1x120xf32> -> vector<1x120xf32>
    %109 = arith.addf %101, %108 : vector<1x120xf32>
    %c11 = arith.constant 11 : index
    %c0_62 = arith.constant 0 : index
    %c0_63 = arith.constant 0 : index
    %110 = vector.load %arg3[%c11, %c0_62, %c0_63] : memref<16x25x120xf32, #tpu.memory_space<vmem>>, vector<1x25x120xf32>
    %111 = vector.shape_cast %110 : vector<1x25x120xf32> to vector<25x120xf32>
    %112 = vector.extract_strided_slice %16 {offsets = [11, 0], sizes = [1, 25], strides = [1, 1]} : vector<16x50xf32> to vector<1x25xf32>
    %cst_64 = arith.constant dense<0.000000e+00> : vector<1x120xf32>
    %113 = tpu.matmul %112, %111, %cst_64 {dimension_numbers = #tpu.dot_dimension_numbers<[1], [0], [0], [1], [0, 0, 1, 1], [], []>} : vector<1x25xf32>, vector<25x120xf32>, vector<1x120xf32> -> vector<1x120xf32>
    %114 = arith.addf %106, %113 : vector<1x120xf32>
    %115 = vector.extract_strided_slice %16 {offsets = [11, 25], sizes = [1, 25], strides = [1, 1]} : vector<16x50xf32> to vector<1x25xf32>
    %cst_65 = arith.constant dense<0.000000e+00> : vector<1x120xf32>
    %116 = tpu.matmul %115, %111, %cst_65 {dimension_numbers = #tpu.dot_dimension_numbers<[1], [0], [0], [1], [0, 0, 1, 1], [], []>} : vector<1x25xf32>, vector<25x120xf32>, vector<1x120xf32> -> vector<1x120xf32>
    %117 = arith.addf %109, %116 : vector<1x120xf32>
    %c12 = arith.constant 12 : index
    %c0_66 = arith.constant 0 : index
    %c0_67 = arith.constant 0 : index
    %118 = vector.load %arg3[%c12, %c0_66, %c0_67] : memref<16x25x120xf32, #tpu.memory_space<vmem>>, vector<1x25x120xf32>
    %119 = vector.shape_cast %118 : vector<1x25x120xf32> to vector<25x120xf32>
    %120 = vector.extract_strided_slice %16 {offsets = [12, 0], sizes = [1, 25], strides = [1, 1]} : vector<16x50xf32> to vector<1x25xf32>
    %cst_68 = arith.constant dense<0.000000e+00> : vector<1x120xf32>
    %121 = tpu.matmul %120, %119, %cst_68 {dimension_numbers = #tpu.dot_dimension_numbers<[1], [0], [0], [1], [0, 0, 1, 1], [], []>} : vector<1x25xf32>, vector<25x120xf32>, vector<1x120xf32> -> vector<1x120xf32>
    %122 = arith.addf %114, %121 : vector<1x120xf32>
    %123 = vector.extract_strided_slice %16 {offsets = [12, 25], sizes = [1, 25], strides = [1, 1]} : vector<16x50xf32> to vector<1x25xf32>
    %cst_69 = arith.constant dense<0.000000e+00> : vector<1x120xf32>
    %124 = tpu.matmul %123, %119, %cst_69 {dimension_numbers = #tpu.dot_dimension_numbers<[1], [0], [0], [1], [0, 0, 1, 1], [], []>} : vector<1x25xf32>, vector<25x120xf32>, vector<1x120xf32> -> vector<1x120xf32>
    %125 = arith.addf %117, %124 : vector<1x120xf32>
    %c13 = arith.constant 13 : index
    %c0_70 = arith.constant 0 : index
    %c0_71 = arith.constant 0 : index
    %126 = vector.load %arg3[%c13, %c0_70, %c0_71] : memref<16x25x120xf32, #tpu.memory_space<vmem>>, vector<1x25x120xf32>
    %127 = vector.shape_cast %126 : vector<1x25x120xf32> to vector<25x120xf32>
    %128 = vector.extract_strided_slice %16 {offsets = [13, 0], sizes = [1, 25], strides = [1, 1]} : vector<16x50xf32> to vector<1x25xf32>
    %cst_72 = arith.constant dense<0.000000e+00> : vector<1x120xf32>
    %129 = tpu.matmul %128, %127, %cst_72 {dimension_numbers = #tpu.dot_dimension_numbers<[1], [0], [0], [1], [0, 0, 1, 1], [], []>} : vector<1x25xf32>, vector<25x120xf32>, vector<1x120xf32> -> vector<1x120xf32>
    %130 = arith.addf %122, %129 : vector<1x120xf32>
    %131 = vector.extract_strided_slice %16 {offsets = [13, 25], sizes = [1, 25], strides = [1, 1]} : vector<16x50xf32> to vector<1x25xf32>
    %cst_73 = arith.constant dense<0.000000e+00> : vector<1x120xf32>
    %132 = tpu.matmul %131, %127, %cst_73 {dimension_numbers = #tpu.dot_dimension_numbers<[1], [0], [0], [1], [0, 0, 1, 1], [], []>} : vector<1x25xf32>, vector<25x120xf32>, vector<1x120xf32> -> vector<1x120xf32>
    %133 = arith.addf %125, %132 : vector<1x120xf32>
    %c14 = arith.constant 14 : index
    %c0_74 = arith.constant 0 : index
    %c0_75 = arith.constant 0 : index
    %134 = vector.load %arg3[%c14, %c0_74, %c0_75] : memref<16x25x120xf32, #tpu.memory_space<vmem>>, vector<1x25x120xf32>
    %135 = vector.shape_cast %134 : vector<1x25x120xf32> to vector<25x120xf32>
    %136 = vector.extract_strided_slice %16 {offsets = [14, 0], sizes = [1, 25], strides = [1, 1]} : vector<16x50xf32> to vector<1x25xf32>
    %cst_76 = arith.constant dense<0.000000e+00> : vector<1x120xf32>
    %137 = tpu.matmul %136, %135, %cst_76 {dimension_numbers = #tpu.dot_dimension_numbers<[1], [0], [0], [1], [0, 0, 1, 1], [], []>} : vector<1x25xf32>, vector<25x120xf32>, vector<1x120xf32> -> vector<1x120xf32>
    %138 = arith.addf %130, %137 : vector<1x120xf32>
    %139 = vector.extract_strided_slice %16 {offsets = [14, 25], sizes = [1, 25], strides = [1, 1]} : vector<16x50xf32> to vector<1x25xf32>
    %cst_77 = arith.constant dense<0.000000e+00> : vector<1x120xf32>
    %140 = tpu.matmul %139, %135, %cst_77 {dimension_numbers = #tpu.dot_dimension_numbers<[1], [0], [0], [1], [0, 0, 1, 1], [], []>} : vector<1x25xf32>, vector<25x120xf32>, vector<1x120xf32> -> vector<1x120xf32>
    %141 = arith.addf %133, %140 : vector<1x120xf32>
    %c15 = arith.constant 15 : index
    %c0_78 = arith.constant 0 : index
    %c0_79 = arith.constant 0 : index
    %142 = vector.load %arg3[%c15, %c0_78, %c0_79] : memref<16x25x120xf32, #tpu.memory_space<vmem>>, vector<1x25x120xf32>
    %143 = vector.shape_cast %142 : vector<1x25x120xf32> to vector<25x120xf32>
    %144 = vector.extract_strided_slice %16 {offsets = [15, 0], sizes = [1, 25], strides = [1, 1]} : vector<16x50xf32> to vector<1x25xf32>
    %cst_80 = arith.constant dense<0.000000e+00> : vector<1x120xf32>
    %145 = tpu.matmul %144, %143, %cst_80 {dimension_numbers = #tpu.dot_dimension_numbers<[1], [0], [0], [1], [0, 0, 1, 1], [], []>} : vector<1x25xf32>, vector<25x120xf32>, vector<1x120xf32> -> vector<1x120xf32>
    %146 = arith.addf %138, %145 : vector<1x120xf32>
    %147 = vector.extract_strided_slice %16 {offsets = [15, 25], sizes = [1, 25], strides = [1, 1]} : vector<16x50xf32> to vector<1x25xf32>
    %cst_81 = arith.constant dense<0.000000e+00> : vector<1x120xf32>
    %148 = tpu.matmul %147, %143, %cst_81 {dimension_numbers = #tpu.dot_dimension_numbers<[1], [0], [0], [1], [0, 0, 1, 1], [], []>} : vector<1x25xf32>, vector<25x120xf32>, vector<1x120xf32> -> vector<1x120xf32>
    %149 = arith.addf %141, %148 : vector<1x120xf32>
    %cst_82 = arith.constant 0.000000e+00 : f32
    %150 = vector.broadcast %cst_82 : f32 to vector<1x120xf32>
    %151 = arith.maximumf %146, %150 : vector<1x120xf32>
    %cst_83 = arith.constant dense<0.000000e+00> : vector<1x84xf32>
    %152 = tpu.matmul %151, %18, %cst_83 {dimension_numbers = #tpu.dot_dimension_numbers<[1], [0], [0], [1], [0, 0, 1, 1], [], []>} : vector<1x120xf32>, vector<120x84xf32>, vector<1x84xf32> -> vector<1x84xf32>
    %153 = arith.addf %152, %19 : vector<1x84xf32>
    %cst_84 = arith.constant 0.000000e+00 : f32
    %154 = vector.broadcast %cst_84 : f32 to vector<1x84xf32>
    %155 = arith.maximumf %153, %154 : vector<1x84xf32>
    %cst_85 = arith.constant dense<0.000000e+00> : vector<1x10xf32>
    %156 = tpu.matmul %155, %20, %cst_85 {dimension_numbers = #tpu.dot_dimension_numbers<[1], [0], [0], [1], [0, 0, 1, 1], [], []>} : vector<1x84xf32>, vector<84x10xf32>, vector<1x10xf32> -> vector<1x10xf32>
    %157 = arith.addf %156, %21 : vector<1x10xf32>
    %c0_86 = arith.constant 0 : index
    %c0_87 = arith.constant 0 : index
    %158 = vector.load %arg9[%c0_86, %c0_87] : memref<2x10xf32, #tpu.memory_space<vmem>>, vector<1x10xf32>
    tpu.vector_store %arg9[%c0_86, %c0_87], %157 {strides = array<i32>} : memref<2x10xf32, #tpu.memory_space<vmem>>, vector<1x10xf32>,
    %cst_88 = arith.constant 0.000000e+00 : f32
    %159 = vector.broadcast %cst_88 : f32 to vector<1x120xf32>
    %160 = arith.maximumf %149, %159 : vector<1x120xf32>
    %cst_89 = arith.constant dense<0.000000e+00> : vector<1x84xf32>
    %161 = tpu.matmul %160, %18, %cst_89 {dimension_numbers = #tpu.dot_dimension_numbers<[1], [0], [0], [1], [0, 0, 1, 1], [], []>} : vector<1x120xf32>, vector<120x84xf32>, vector<1x84xf32> -> vector<1x84xf32>
    %162 = arith.addf %161, %19 : vector<1x84xf32>
    %cst_90 = arith.constant 0.000000e+00 : f32
    %163 = vector.broadcast %cst_90 : f32 to vector<1x84xf32>
    %164 = arith.maximumf %162, %163 : vector<1x84xf32>
    %cst_91 = arith.constant dense<0.000000e+00> : vector<1x10xf32>
    %165 = tpu.matmul %164, %20, %cst_91 {dimension_numbers = #tpu.dot_dimension_numbers<[1], [0], [0], [1], [0, 0, 1, 1], [], []>} : vector<1x84xf32>, vector<84x10xf32>, vector<1x10xf32> -> vector<1x10xf32>
    %166 = arith.addf %165, %21 : vector<1x10xf32>
    %c1_92 = arith.constant 1 : index
    %c0_93 = arith.constant 0 : index
    %167 = vector.load %arg9[%c1_92, %c0_93] : memref<2x10xf32, #tpu.memory_space<vmem>>, vector<1x10xf32>
    tpu.vector_store %arg9[%c1_92, %c0_93], %166 {strides = array<i32>} : memref<2x10xf32, #tpu.memory_space<vmem>>, vector<1x10xf32>,
    return
  }
}

</mosaic_0001>

<bundles_post_ra>
// kernel: lenet_forward.2
= control target key start
LH: loop header
LB: loop body
LE: loop exit
PB: predicated region body
PF: predicated region fallthrough
CT: control target
= control target key end

     0   :  { %vm77_vm0 = vcmask 1040384   ;;  %v821_v3 = vmov 0.0   ;;  %v822_v8 = vmov 0   ;;  %vm823_vm1 = vmmov 1   ;;  %s827_s8 = smov 112   ;;  %s828_s9 = smov 104   ;;  %s1089_s0 = inlined_call_operand.vmem [shape: f32[25,1568], index: 0, kind: input, shape index: {}]   ;;  %s1090_s1 = inlined_call_operand.vmem [shape: f32[6,25], index: 1, kind: input, shape index: {}]   ;;  %s1091_s2 = inlined_call_operand.vmem [shape: f32[6,1], index: 2, kind: input, shape index: {}]   ;;  %s1092_s3 = inlined_call_operand.vmem [shape: f32[6,392], index: 3, kind: output, shape index: {}]  }
   0x1   :  { %v16_v0 = vld [vmem:[%s1089_s0 + $0x8] sm:$0xff]  ;;  %v29_v1 = vld [vmem:[%s1089_s0 + $0x70] sm:$0xff]  ;;  %v18_v2 = vld [vmem:[%s1089_s0 + $0x18] sm:$0xff]  ;;  %181 = vmatprep.mubr.f32.mxu0 %v821_v3  ;;  %252 = vmatprep.mubr.f32.mxu1 %v821_v3  ;;  %vm73_vm3 = vcmask 203776   ;;  %vm825_vm4 = vmmov 0   ;;  %vm638_vm5 = vcmask 982016  }
   0x2   :  { %v745_v4 = vpack.c.bf16 %v29_v1, %v16_v0  ;;  %v31_v5 = vld [vmem:[%s1089_s0 + $0x80] sm:$0xff]  ;;  %v28_v7 = vld [vmem:[%s1089_s0 + $0x68] sm:$0xff]  ;;  %820 = vset.pattern.permute.xlu0 %v822_v8  ;;  %v17_v11 = vld [vmem:[%s1089_s0 + $0x10] sm:$0xff]  ;;  %vm661_vm6 = vcmask 916480   ;;  %vm684_vm7 = vcmask 850944   ;;  %vm703_vm8 = vcmask 62464  }
   0x3   :  { %v15_v6 = vld [vmem:[%s1089_s0] sm:$0xff]  ;;  %v755_v9 = vpack.c.bf16 %v31_v5, %v18_v2  ;;  %v30_v12 = vld [vmem:[%s1089_s0 + $0x78] sm:$0xff]  ;;  %vm882_vm2 = vmpackc.low %vm77_vm0, %vm823_vm1 }
   0x4   :  { %v747_v10 = vpack.c.bf16 %v28_v7, %v15_v6  ;;  %v42_v13 = vld [vmem:[%s1089_s0 + $0xd8] sm:$0xff]  ;;  %746 = vmatprep.subr.bf16.mxu0 %v745_v4  ;;  %v757_v14 = vpack.c.bf16 %v30_v12, %v17_v11  ;;  %v55_v15 = vld [vmem:[%s1089_s0 + $0x140] sm:$0x1]  ;;  %v44_v17 = vld [vmem:[%s1089_s0 + $0xe8] sm:$0xff] }
   0x5   :  { %756 = vmatprep.subr.bf16.mxu1 %v755_v9  ;;  %v749_v18 = vpack.c.bf16 %v55_v15, %v42_v13  ;;  %v57_v19 = vld [vmem:[%s1089_s0 + $0x150] sm:$0x1]  ;;  %v54_v21 = vld [vmem:[%s1089_s0 + $0x138] sm:$0x1]  ;;  %v43_v24 = vld [vmem:[%s1089_s0 + $0xe0] sm:$0xff] }
   0x6   :  { %748 = vmatpush1.bf16.msra.mxu0 %v747_v10  ;;  %v41_v20 = vld [vmem:[%s1089_s0 + $0xd0] sm:$0xff]  ;;  %758 = vmatpush1.bf16.msra.mxu1 %v757_v14  ;;  %v759_v22 = vpack.c.bf16 %v57_v19, %v44_v17  ;;  %v56_v25 = vld [vmem:[%s1089_s0 + $0x148] sm:$0x1]  ;;  %v909_v27 = vld [vmem:[%s1090_s1] sm:$0x3f] }
   0x7   :  { %v752_v23 = vpack.c.bf16 %v54_v21, %v41_v20  ;;  %751 = vmatprep.subr.msk.bf16.mxu0 %vm882_vm2, %v749_v18  ;;  %v762_v26 = vpack.c.bf16 %v56_v25, %v43_v24  ;;  %v20_v28 = vld [vmem:[%s1089_s0 + $0x28] sm:$0xff]  ;;  %v33_v29 = vld [vmem:[%s1089_s0 + $0x90] sm:$0xff]  ;;  %v22_v30 = vld [vmem:[%s1089_s0 + $0x38] sm:$0xff]  ;;  %v824_v18 = vmov 0.0|0.0  }
   0x8   :  { %761 = vmatprep.subr.msk.bf16.mxu1 %vm882_vm2, %v759_v22  ;;  %v765_v31 = vpack.c.bf16 %v33_v29, %v20_v28  ;;  %v35_v32 = vld [vmem:[%s1089_s0 + $0xa0] sm:$0xff]  ;;  %v32_v34 = vld [vmem:[%s1089_s0 + $0x88] sm:$0xff]  ;;  %v21_v37 = vld [vmem:[%s1089_s0 + $0x30] sm:$0xff] }
   0x9   :  { %v19_v33 = vld [vmem:[%s1089_s0 + $0x20] sm:$0xff]  ;;  %v775_v35 = vpack.c.bf16 %v35_v32, %v22_v30  ;;  %v34_v38 = vld [vmem:[%s1089_s0 + $0x98] sm:$0xff]  ;;  %v48_v42 = vld [vmem:[%s1089_s0 + $0x108] sm:$0xff] }
   0xa   :  { %754 = vmatpush1.bf16.msk.msra.mxu0 %vm882_vm2, %v752_v23  ;;  %v767_v36 = vpack.c.bf16 %v32_v34, %v19_v33  ;;  %v46_v39 = vld [vmem:[%s1089_s0 + $0xf8] sm:$0xff]  ;;  %764 = vmatpush1.bf16.msk.msra.mxu1 %vm882_vm2, %v762_v26  ;;  %v777_v40 = vpack.c.bf16 %v34_v38, %v21_v37  ;;  %v59_v41 = vld [vmem:[%s1089_s0 + $0x160] sm:$0x1]  ;;  %v61_v43 = vld [vmem:[%s1089_s0 + $0x170] sm:$0x1] }
   0xb   :  { %766 = vmatprep.subr.bf16.mxu0 %v765_v31  ;;  %776 = vmatprep.subr.bf16.mxu1 %v775_v35  ;;  %v769_v44 = vpack.c.bf16 %v59_v41, %v46_v39  ;;  %v779_v45 = vpack.c.bf16 %v61_v43, %v48_v42  ;;  %v45_v46 = vld [vmem:[%s1089_s0 + $0xf0] sm:$0xff]  ;;  %v58_v47 = vld [vmem:[%s1089_s0 + $0x158] sm:$0x1]  ;;  %v47_v48 = vld [vmem:[%s1089_s0 + $0x100] sm:$0xff] }
   0xc   :  { %v60_v49 = vld [vmem:[%s1089_s0 + $0x168] sm:$0x1]  ;;  %v37_v51 = vld [vmem:[%s1089_s0 + $0xb0] sm:$0xff]  ;;  %v772_v52 = vpack.c.bf16 %v58_v47, %v45_v46  ;;  %v26_v53 = vld [vmem:[%s1089_s0 + $0x58] sm:$0xff] }
   0xd   :  { %711 = vmatmul.mubr.msk.f32.vlgmr.msra.gmra.mrb[0].mxu0 %vm73_vm3, %v909_v27  ;;  %v24_v50 = vld [vmem:[%s1089_s0 + $0x48] sm:$0xff]  ;;  %714 = vmatmul.mubr.msk.f32.vlgmr.msra.gmra.mrb[0].mxu1 %vm73_vm3, %v909_v27  ;;  %v39_v54 = vld [vmem:[%s1089_s0 + $0xc0] sm:$0xff]  ;;  %v782_v55 = vpack.c.bf16 %v60_v49, %v47_v48  ;;  %v25_v59 = vld [vmem:[%s1089_s0 + $0x50] sm:$0xff] }
   0xe   :  { %768 = vmatpush1.bf16.msra.mxu0 %v767_v36  ;;  %778 = vmatpush1.bf16.msra.mxu1 %v777_v40  ;;  %v785_v56 = vpack.c.bf16 %v37_v51, %v24_v50  ;;  %v23_v57 = vld [vmem:[%s1089_s0 + $0x40] sm:$0xff]  ;;  %v36_v58 = vld [vmem:[%s1089_s0 + $0xa8] sm:$0xff]  ;;  %v795_v60 = vpack.c.bf16 %v39_v54, %v26_v53  ;;  %v38_v61 = vld [vmem:[%s1089_s0 + $0xb8] sm:$0xff] }
   0xf   :  { %771 = vmatprep.subr.msk.bf16.mxu0 %vm882_vm2, %v769_v44  ;;  %781 = vmatprep.subr.msk.bf16.mxu1 %vm882_vm2, %v779_v45  ;;  %v50_v62 = vld [vmem:[%s1089_s0 + $0x118] sm:$0xff]  ;;  %v63_v63 = vld [vmem:[%s1089_s0 + $0x180] sm:$0x1]  ;;  %v52_v0 = vld [vmem:[%s1089_s0 + $0x128] sm:$0xff]  ;;  %v787_v2 = vpack.c.bf16 %v36_v58, %v23_v57  ;;  %v797_v4 = vpack.c.bf16 %v38_v61, %v25_v59 }
  0x10   :  { %323 = vmatprep.mubr.f32.mxu0 %v821_v3  ;;  %394 = vmatprep.mubr.f32.mxu1 %v821_v3  ;;  %v65_v1 = vld [vmem:[%s1089_s0 + $0x190] sm:$0x1]  ;;  %v789_v5 = vpack.c.bf16 %v63_v63, %v50_v62  ;;  %v62_v7 = vld [vmem:[%s1089_s0 + $0x178] sm:$0x1]  ;;  %v51_v9 = vld [vmem:[%s1089_s0 + $0x120] sm:$0xff] }
  0x11   :  { %v49_v6 = vld [vmem:[%s1089_s0 + $0x110] sm:$0xff]  ;;  %v799_v8 = vpack.c.bf16 %v65_v1, %v52_v0  ;;  %v64_v10 = vld [vmem:[%s1089_s0 + $0x188] sm:$0x1]  ;;  %v67_v11 = vld [vmem:[%s1091_s2] sm:$0x3f] }
  0x12   :  { %774 = vmatpush1.bf16.msk.msra.mxu0 %vm882_vm2, %v772_v52  ;;  %784 = vmatpush1.bf16.msk.msra.mxu1 %vm882_vm2, %v782_v55  ;;  %v792_v12 = vpack.c.bf16 %v62_v7, %v49_v6  ;;  %v802_v13 = vpack.c.bf16 %v64_v10, %v51_v9  ;;  %v27_v14 = vld [vmem:[%s1089_s0 + $0x60] sm:$0xff]  ;;  %v40_v15 = vld [vmem:[%s1089_s0 + $0xc8] sm:$0xff]  ;;  %v53_v19 = vld [vmem:[%s1089_s0 + $0x130] sm:$0xff] }
  0x13   :  { %786 = vmatprep.subr.bf16.mxu0 %v785_v56  ;;  %796 = vmatprep.subr.bf16.mxu1 %v795_v60  ;;  %v806_v17 = vpack.c.bf16 %v40_v15, %v27_v14  ;;  %v66_v20 = vld [vmem:[%s1089_s0 + $0x198] sm:$0x1]  ;;  %s826_s0 = smov 120  }
  0x14   :  { %70 = vperm.xlu0 %820, %v67_v11   ;;  %v809_v21 = vpack.c.bf16 %v66_v20, %v53_v19 }
  0x15   :  { %717 = vmatmul.mubr.msk.f32.vlgmr.msra.gmra.mrb[2].mxu0 %vm73_vm3, %v909_v27  ;;  %720 = vmatmul.mubr.msk.f32.vlgmr.msra.gmra.mrb[2].mxu1 %vm73_vm3, %v909_v27 }
  0x16   :  { %788 = vmatpush1.bf16.msra.mxu0 %v787_v2  ;;  %798 = vmatpush1.bf16.msra.mxu1 %v797_v4 }
  0x17   :  { %791 = vmatprep.subr.msk.bf16.mxu0 %vm882_vm2, %v789_v5  ;;  %801 = vmatprep.subr.msk.bf16.mxu1 %vm882_vm2, %v799_v8 }
  0x18   :  { %465 = vmatprep.mubr.f32.mxu0 %v821_v3  ;;  %536 = vmatprep.mubr.f32.mxu1 %v821_v3 }
  0x1a   :  { %794 = vmatpush1.bf16.msk.msra.mxu0 %vm882_vm2, %v792_v12  ;;  %804 = vmatpush1.bf16.msk.msra.mxu1 %vm882_vm2, %v802_v13 }
  0x1b   :  { %805 = vmatprep.subr.bf16.mxu0 %v824_v18 }
  0x1d   :  { %723 = vmatmul.mubr.msk.f32.vlgmr.msra.gmra.mrb[4].mxu0 %vm73_vm3, %v909_v27  ;;  %726 = vmatmul.mubr.msk.f32.vlgmr.msra.gmra.mrb[4].mxu1 %vm73_vm3, %v909_v27 }
  0x1e   :  { %807 = vmatpush3.bf16.msra.mxu0 %v806_v17  ;;  %742 = vmatprep.mubr.msk.f32.mxu0 %vm825_vm4, %v821_v3 }
  0x1f   :  { %808 = vmatprep.subr.bf16.mxu0 %v824_v18 }
  0x22   :  { %811 = vmatpush3.bf16.msk.msra.mxu0 %vm882_vm2, %v809_v21 }
  0x25   :  { %743 = vmatmul.mubr.msk.f32.vlgmr.msra.gmra.mrb[6].mxu0 %vm73_vm3, %v909_v27 }
  0x93   :  { %v71_v25 = vpop.permute.xlu0 %70 }
  0xe0   :  { %v183_v22 = vpop.f32.mrb[0].mxu0  ;;  %v254_v24 = vpop.f32.mrb[0].mxu1 }
  0xe1   :  { %v185_v23 = vpop.f32.mrb[1].mxu0  ;;  %v256_v26 = vpop.f32.mrb[1].mxu1  ;;  %v184_v60 = vadd.f32 %v183_v22, %v71_v25  ;;  %v255_v1 = vadd.f32 %v254_v24, %v71_v25 }
  0xe2   :  { %v1065_v28 = vadd.f32 %v256_v26, %v71_v25  ;;  %v186_v0 = vadd.f32 %v185_v23, %v71_v25 }
  0xe3   :  { %v613_v2 = vmax.f32 %v184_v60, 0.0  ;;  %v615_v12 = vmax.f32 %v255_v1, 0.0 }
  0xe4   :  { %v616_v29 = vmax.f32 %v1065_v28, 0.0  ;;  %v614_v11 = vmax.f32 %v186_v0, 0.0 }
  0xe6   :  { %630 = vrot.lane.b32.xlu0 %v616_v29, %s826_s0 }
  0xe8   :  { %v325_v30 = vpop.f32.mrb[2].mxu0  ;;  %v396_v3 = vpop.f32.mrb[2].mxu1 }
  0xe9   :  { %v326_v31 = vadd.f32 %v325_v30, %v71_v25  ;;  %v327_v32 = vpop.f32.mrb[3].mxu0  ;;  %v397_v16 = vadd.f32 %v396_v3, %v71_v25  ;;  %v398_v33 = vpop.f32.mrb[3].mxu1 }
  0xea   :  { %v399_v27 = vadd.f32 %v398_v33, %v71_v25  ;;  %v328_v36 = vadd.f32 %v327_v32, %v71_v25 }
  0xeb   :  { %v617_v34 = vmax.f32 %v326_v31, 0.0  ;;  %v619_v35 = vmax.f32 %v397_v16, 0.0 }
  0xec   :  { %v620_v37 = vmax.f32 %v399_v27, 0.0  ;;  %v618_v43 = vmax.f32 %v328_v36, 0.0 }
  0xed   :  { %632 = vrot.lane.b32.xlu1 %v617_v34, %s826_s0  ;;  %636 = vrot.lane.b32.xlu0 %v619_v35, %s826_s0 }
  0xf0   :  { %v467_v38 = vpop.f32.mrb[4].mxu0  ;;  %v538_v39 = vpop.f32.mrb[4].mxu1 }
  0xf1   :  { %v469_v40 = vpop.f32.mrb[5].mxu0  ;;  %653 = vrot.lane.b32.xlu1 %v619_v35, %s827_s8  ;;  %v539_v41 = vadd.f32 %v538_v39, %v71_v25  ;;  %v540_v42 = vpop.f32.mrb[5].mxu1  ;;  %655 = vrot.lane.b32.xlu0 %v620_v37, %s827_s8  ;;  %v468_v44 = vadd.f32 %v467_v38, %v71_v25 }
  0xf2   :  { %v470_v46 = vadd.f32 %v469_v40, %v71_v25  ;;  %v541_v52 = vadd.f32 %v540_v42, %v71_v25 }
  0xf3   :  { %v623_v45 = vmax.f32 %v539_v41, 0.0  ;;  %v621_v47 = vmax.f32 %v468_v44, 0.0 }
  0xf4   :  { %v622_v48 = vmax.f32 %v470_v46, 0.0  ;;  %v624_v54 = vmax.f32 %v541_v52, 0.0 }
  0xf5   :  { %634 = vrot.lane.b32.xlu1 %v618_v43, %s826_s0  ;;  %678 = vrot.lane.b32.xlu0 %v623_v45, %s828_s9 }
  0xf8   :  { %v609_v49 = vpop.f32.mrb[6].mxu0 }
  0xf9   :  { %v610_v50 = vadd.f32 %v609_v49, %v71_v25  ;;  %657 = vrot.lane.b32.xlu1 %v621_v47, %s827_s8  ;;  %v744_v51 = vpop.f32.mrb[7].mxu0  ;;  %659 = vrot.lane.b32.xlu0 %v622_v48, %s827_s8 }
  0xfb   :  { %v625_v53 = vmax.f32 %v610_v50, 0.0 }
  0xfd   :  { %676 = vrot.lane.b32.xlu1 %v622_v48, %s828_s9  ;;  %682 = vrot.lane.b32.xlu0 %v625_v53, %s828_s9 }
 0x101   :  { %680 = vrot.lane.b32.xlu1 %v624_v54, %s828_s9 }
 0x158   :  { %v631_v55 = vpop.permute.xlu0 %630 }
 0x15f   :  { %v633_v56 = vpop.permute.xlu1 %632  ;;  %v637_v57 = vpop.permute.xlu0 %636 }
 0x160   :  { %v639_v63 = vsel %vm638_vm5, %v631_v55, %v633_v56  ;;  %v649_v7 = vadd.f32 %v637_v57, %v616_v29 }
 0x161   :  { %v646_v8 = vadd.f32 %v639_v63, %v613_v2 }
 0x163   :  { %v654_v58 = vpop.permute.xlu1 %653  ;;  %v656_v59 = vpop.permute.xlu0 %655 }
 0x164   :  { %v662_v5 = vsel %vm661_vm6, %v654_v58, %v656_v59 }
 0x165   :  { %v669_v13 = vadd.f32 %v662_v5, %v646_v8 }
 0x167   :  { %v635_v61 = vpop.permute.xlu1 %634  ;;  %v679_v62 = vpop.permute.xlu0 %678 }
 0x168   :  { %v640_v9 = vsel %vm638_vm5, %v633_v56, %v635_v61  ;;  %v641_v10 = vsel %vm638_vm5, %v635_v61, %v637_v57 }
 0x169   :  { %v647_v21 = vadd.f32 %v640_v9, %v614_v11  ;;  %v648_v22 = vadd.f32 %v641_v10, %v615_v12 }
 0x16b   :  { %v658_v4 = vpop.permute.xlu1 %657  ;;  %v660_v6 = vpop.permute.xlu0 %659 }
 0x16c   :  { %v672_v14 = vadd.f32 %v660_v6, %v649_v7  ;;  %v663_v17 = vsel %vm661_vm6, %v656_v59, %v658_v4  ;;  %v664_v18 = vsel %vm661_vm6, %v658_v4, %v660_v6 }
 0x16d   :  { %v670_v25 = vadd.f32 %v663_v17, %v647_v21  ;;  %v671_v26 = vadd.f32 %v664_v18, %v648_v22 }
 0x16f   :  { %v677_v15 = vpop.permute.xlu1 %676  ;;  %v683_v19 = vpop.permute.xlu0 %682 }
 0x170   :  { %v685_v20 = vsel %vm684_vm7, %v677_v15, %v679_v62  ;;  %v695_v23 = vadd.f32 %v683_v19, %v672_v14 }
 0x171   :  { %v692_v24 = vadd.f32 %v685_v20, %v669_v13 }
 0x172   :  { %v699_v28 = vmul.f32 0.25, %v695_v23 }
 0x173   :  { %v696_v29 = vmul.f32 0.25, %v692_v24  ;;  %v681_v30 = vpop.permute.xlu1 %680 }
 0x174   :  { %v686_v31 = vsel %vm684_vm7, %v679_v62, %v681_v30  ;;  %v687_v3 = vsel %vm684_vm7, %v681_v30, %v683_v19  ;;  %704 = vst.msk [vmem:[%s1092_s3 + $0x18] sm:$0x3f] %vm703_vm8, %v699_v28 }
 0x175   :  { %700 = vst [vmem:[%s1092_s3] sm:$0x3f] %v696_v29  ;;  %v693_v32 = vadd.f32 %v686_v31, %v670_v25  ;;  %v694_v16 = vadd.f32 %v687_v3, %v671_v26 }
 0x177   :  { %v697_v33 = vmul.f32 0.25, %v693_v32  ;;  %v698_v34 = vmul.f32 0.25, %v694_v16 }
 0x179   :  { %701 = vst [vmem:[%s1092_s3 + $0x8] sm:$0x3f] %v697_v33  ;;  %702 = vst [vmem:[%s1092_s3 + $0x10] sm:$0x3f] %v698_v34 }

// kernel: lenet_forward.3
= control target key start
LH: loop header
LB: loop body
LE: loop exit
PB: predicated region body
PF: predicated region fallthrough
CT: control target
= control target key end

     0   :  { %v4326_v7 = vmov 0   ;;  %vm87_vm0 = vcmask 179200   ;;  %s5220_s0 = inlined_call_operand.vmem [shape: f32[150,200], index: 0, kind: input, shape index: {}]   ;;  %s5221_s1 = inlined_call_operand.vmem [shape: f32[16,150], index: 1, kind: input, shape index: {}]   ;;  %s5222_s2 = inlined_call_operand.vmem [shape: f32[16,1], index: 2, kind: input, shape index: {}]   ;;  %s5223_s3 = inlined_call_operand.vmem [shape: f32[16,25,120], index: 3, kind: input, shape index: {}]   ;;  %s5224_s4 = inlined_call_operand.vmem [shape: f32[1,120], index: 4, kind: input, shape index: {}]   ;;  %s5225_s5 = inlined_call_operand.vmem [shape: f32[120,84], index: 5, kind: input, shape index: {}]   ;;  %s5226_s6 = inlined_call_operand.vmem [shape: f32[1,84], index: 6, kind: input, shape index: {}]   ;;  %s5227_s7 = inlined_call_operand.vmem [shape: f32[84,10], index: 7, kind: input, shape index: {}]   ;;  %s5228_s8 = inlined_call_operand.vmem [shape: f32[1,10], index: 8, kind: input, shape index: {}]   ;;  %s5229_s9 = inlined_call_operand.hbm [shape: f32[2,10], index: 9, kind: output, shape index: {}]  }
   0x1   :  { %v38_v0 = vld [vmem:[%s5220_s0 + $0x8] sm:$0xff]  ;;  %v40_v1 = vld [vmem:[%s5220_s0 + $0x18] sm:$0xff]  ;;  %v37_v2 = vld [vmem:[%s5220_s0] sm:$0xff]  ;;  %4300 = vset.pattern.permute.xlu0 %v4326_v7  ;;  %4301 = vset.pattern.permute.xlu1 %v4326_v7 }
   0x2   :  { %v3898_v3 = vpack.c.bf16 %v40_v1, %v38_v0  ;;  %v39_v4 = vld [vmem:[%s5220_s0 + $0x10] sm:$0xff]  ;;  %v42_v5 = vld [vmem:[%s5220_s0 + $0x28] sm:$0xff]  ;;  %v44_v6 = vld [vmem:[%s5220_s0 + $0x38] sm:$0xff] }
   0x3   :  { %v3900_v8 = vpack.c.bf16 %v39_v4, %v37_v2  ;;  %v3902_v9 = vpack.c.bf16 %v44_v6, %v42_v5  ;;  %v41_v10 = vld [vmem:[%s5220_s0 + $0x20] sm:$0xff]  ;;  %v43_v11 = vld [vmem:[%s5220_s0 + $0x30] sm:$0xff]  ;;  %v46_v12 = vld [vmem:[%s5220_s0 + $0x48] sm:$0xff] }
   0x4   :  { %3899 = vmatprep.subr.bf16.mxu0 %v3898_v3  ;;  %v48_v13 = vld [vmem:[%s5220_s0 + $0x58] sm:$0xff]  ;;  %v3904_v14 = vpack.c.bf16 %v43_v11, %v41_v10  ;;  %v45_v16 = vld [vmem:[%s5220_s0 + $0x40] sm:$0xff]  ;;  %v47_v17 = vld [vmem:[%s5220_s0 + $0x50] sm:$0xff] }
   0x5   :  { %3901 = vmatpush1.bf16.msra.mxu0 %v3900_v8  ;;  %v3906_v15 = vpack.c.bf16 %v48_v13, %v46_v12  ;;  %v50_v18 = vld [vmem:[%s5220_s0 + $0x68] sm:$0xff]  ;;  %v52_v19 = vld [vmem:[%s5220_s0 + $0x78] sm:$0xff]  ;;  %v3908_v20 = vpack.c.bf16 %v47_v17, %v45_v16  ;;  %v49_v22 = vld [vmem:[%s5220_s0 + $0x60] sm:$0xff] }
   0x6   :  { %3903 = vmatprep.subr.bf16.mxu0 %v3902_v9  ;;  %v3910_v21 = vpack.c.bf16 %v52_v19, %v50_v18  ;;  %v51_v23 = vld [vmem:[%s5220_s0 + $0x70] sm:$0xff]  ;;  %v54_v24 = vld [vmem:[%s5220_s0 + $0x88] sm:$0xff]  ;;  %v56_v25 = vld [vmem:[%s5220_s0 + $0x98] sm:$0xff] }
   0x7   :  { %v3912_v26 = vpack.c.bf16 %v51_v23, %v49_v22  ;;  %v34_v27 = vld [vmem:[%s5221_s1 + $0x8] sm:$0xff]  ;;  %v3914_v28 = vpack.c.bf16 %v56_v25, %v54_v24  ;;  %v53_v29 = vld [vmem:[%s5220_s0 + $0x80] sm:$0xff]  ;;  %v55_v30 = vld [vmem:[%s5220_s0 + $0x90] sm:$0xff] }
   0x8   :  { %3082 = vmatprep.mubr.msk.f32.mxu0 %vm87_vm0, %v34_v27  ;;  %v75_v31 = vld [vmem:[%s5222_s2] sm:$0xff]  ;;  %v58_v32 = vld [vmem:[%s5220_s0 + $0xa8] sm:$0xff]  ;;  %v60_v33 = vld [vmem:[%s5220_s0 + $0xb8] sm:$0xff] }
   0x9   :  { %3905 = vmatpush1.bf16.msra.mxu0 %v3904_v14  ;;  %79 = vperm.xlu0 %4300, %v75_v31  }
   0xa   :  { %3907 = vmatprep.subr.bf16.mxu0 %v3906_v15 }
   0xd   :  { %3909 = vmatpush1.bf16.msra.mxu0 %v3908_v20 }
   0xe   :  { %3911 = vmatprep.subr.bf16.mxu0 %v3910_v21 }
   0xf   :  { %14 = vsyncpa [#allocation3], 0  ;;  %v3916_v34 = vpack.c.bf16 %v55_v30, %v53_v29  ;;  %v3918_v35 = vpack.c.bf16 %v60_v33, %v58_v32  ;;  %v57_v36 = vld [vmem:[%s5220_s0 + $0xa0] sm:$0xff]  ;;  %v59_v37 = vld [vmem:[%s5220_s0 + $0xb0] sm:$0xff]  ;;  %vm94_vm1 = vcmask 1045504   ;;  %v4327_v62 = vmov 0.0|0.0  }
  0x10   :  { %v62_v38 = vld [vmem:[%s5220_s0 + $0xc8] sm:$0xff]  ;;  %v64_v39 = vld [vmem:[%s5220_s0 + $0xd8] sm:$0xff]  ;;  %v3920_v40 = vpack.c.bf16 %v59_v37, %v57_v36  ;;  %v61_v42 = vld [vmem:[%s5220_s0 + $0xc0] sm:$0xff]  ;;  %3983 = vmatprep.subr.bf16.mxu1 %v4327_v62  ;;  %vm256_vm2 = vcmask 1040384   ;;  %vm4328_vm3 = vmmov 1   ;;  %vm4329_vm5 = vmmov 0  }
  0x11   :  { %3913 = vmatpush1.bf16.msra.mxu0 %v3912_v26  ;;  %v3922_v41 = vpack.c.bf16 %v64_v39, %v62_v38  ;;  %v63_v43 = vld [vmem:[%s5220_s0 + $0xd0] sm:$0xff]  ;;  %v66_v44 = vld [vmem:[%s5220_s0 + $0xe8] sm:$0xff]  ;;  %v68_v45 = vld [vmem:[%s5220_s0 + $0xf8] sm:$0xff]  ;;  %v4330_v10 = vmov 0.0   ;;  %s4331_s17 = smov 28   ;;  %s4332_s18 = smov 78  }
  0x12   :  { %3915 = vmatprep.subr.bf16.mxu0 %v3914_v28  ;;  %v3924_v46 = vpack.c.bf16 %v63_v43, %v61_v42  ;;  %v3926_v47 = vpack.c.bf16 %v68_v45, %v66_v44  ;;  %v65_v48 = vld [vmem:[%s5220_s0 + $0xe0] sm:$0xff]  ;;  %v67_v49 = vld [vmem:[%s5220_s0 + $0xf0] sm:$0xff]  ;;  %v70_v50 = vld [vmem:[%s5220_s0 + $0x108] sm:$0xff]  ;;  %3515 = vmatprep.mubr.msk.f32.mxu1 %vm4329_vm5, %v4330_v10  ;;  %s4333_s19 = smov 106   ;;  %vm202_vm6 = vcmask 228352   ;;  %vm252_vm7 = vcmask 203776  }
  0x13   :  { %v72_v51 = vld [vmem:[%s5220_s0 + $0x118] sm:$0xff]  ;;  %v3928_v52 = vpack.c.bf16 %v67_v49, %v65_v48  ;;  %v69_v54 = vld [vmem:[%s5220_s0 + $0x100] sm:$0xff]  ;;  %v71_v55 = vld [vmem:[%s5220_s0 + $0x110] sm:$0xff]  ;;  %vm2762_vm8 = vcmask 982016   ;;  %vm2841_vm9 = vcmask 1043456   ;;  %vm2837_vm10 = vcmask 687104  }
  0x14   :  { %v3930_v53 = vpack.c.bf16 %v72_v51, %v70_v50  ;;  %v3932_v56 = vpack.c.bf16 %v71_v55, %v69_v54  ;;  %v74_v57 = vld [vmem:[%s5220_s0 + $0x128] sm:$0x3f]  ;;  %v73_v58 = vld [vmem:[%s5220_s0 + $0x120] sm:$0x3f]  ;;  %v36_v60 = vld [vmem:[%s5221_s1 + $0x18] sm:$0xff]  ;;  %vm2915_vm11 = vcmask 73728  }
  0x15   :  { %3917 = vmatpush1.bf16.msra.mxu0 %v3916_v34  ;;  %v33_v59 = vld [vmem:[%s5221_s1] sm:$0xff]  ;;  %v35_v61 = vld [vmem:[%s5221_s1 + $0x10] sm:$0xff]  ;;  %v249_v0 = vld [vmem:[%s5223_s3 + $0x8] sm:$0xff]  ;;  %s4335_s26 = smov [#allocation2]  }
  0x16   :  { %3919 = vmatprep.subr.bf16.mxu0 %v3918_v35  ;;  %v248_v63 = vld [vmem:[%s5223_s3] sm:$0xff]  ;;  %v250_v2 = vld [vmem:[%s5223_s3 + $0x10] sm:$0xff]  ;;  %v251_v3 = vld [vmem:[%s5223_s3 + $0x18] sm:$0x1]  ;;  %s3072_s27 = sshll.u32 %s4335_s26, 4  ;;  %s3073_s27 = int_to_ptr.vmem [resolvable:$true] %s3072_s27 }
  0x17   :  { %v3935_v1 = vpack.c.bf16 %v249_v0, %v248_v63  ;;  %v3938_v5 = vpack.c.bf16 %v251_v3, %v250_v2  ;;  %vm4532_vm4 = vmpackc.low %vm256_vm2, %vm4328_vm3  ;;  %v76_v16 = vld [vmem:[%s5222_s2 + $0x8] sm:$0xff]  ;;  %v3104_v17 = vld [vmem:[%s5223_s3 + $0x60] sm:$0xff]  ;;  %s4334_s2 = smov 103   ;;  %s4302_s28 = scalar_lea.vmem %s3073_s27, 32 }
  0x18   :  { %v3105_v18 = vld [vmem:[%s5223_s3 + $0x68] sm:$0xff]  ;;  %v3106_v19 = vld [vmem:[%s5223_s3 + $0x70] sm:$0xff]  ;;  %v3107_v21 = vld [vmem:[%s5223_s3 + $0x78] sm:$0x1]  ;;  %p4303_p0 = scmp.ne.s32.totalorder %s3073_s27, %s4302_s28  ;;  %p4307_p1 = scmp.lt.s32.totalorder %s3073_s27, %s3073_s27 }
  0x19   :  { %3921 = vmatpush1.bf16.msra.mxu0 %v3920_v40  ;;  %v4559_v20 = vpack.c.bf16 %v3105_v18, %v3104_v17  ;;  %v4565_v22 = vpack.c.bf16 %v3107_v21, %v3106_v19  ;;  %v3112_v42 = vld [vmem:[%s5223_s3 + $0x80] sm:$0xff]  ;;  %v3113_v43 = vld [vmem:[%s5223_s3 + $0x88] sm:$0xff]  ;;  %v3114_v45 = vld [vmem:[%s5223_s3 + $0x90] sm:$0xff]  ;;  %p4308_p2 = scmp.lt.s32.totalorder %s4302_s28, %s4302_s28 }
  0x1a   :  { %3923 = vmatprep.subr.bf16.mxu0 %v3922_v41  ;;  %v3991_v44 = vpack.c.bf16 %v3113_v43, %v3112_v42  ;;  %v3120_v49 = vld [vmem:[%s5223_s3 + $0xa0] sm:$0xff]  ;;  %v3121_v50 = vld [vmem:[%s5223_s3 + $0xa8] sm:$0xff]  ;;  %v3122_v54 = vld [vmem:[%s5223_s3 + $0xb0] sm:$0xff] }
  0x1b   :  { %3985 = vmatpush3.bf16.msra.mxu1 %v4559_v20  ;;  %v3123_v55 = vld [vmem:[%s5223_s3 + $0xb8] sm:$0x1]  ;;  %v3136_v21 = vld [vmem:[%s5223_s3 + $0xe0] sm:$0xff]  ;;  %p4309_p3 = por %p4308_p2, %p4307_p1 }
  0x1c   :  { %3986 = vmatprep.subr.bf16.mxu1 %v4327_v62  ;;  %v3155_v42 = vld [vmem:[%s5223_s3 + $0x138] sm:$0x1] }
  0x1d   :  { %3925 = vmatpush1.bf16.msra.mxu0 %v3924_v46  ;;  %v3115_v46 = vld [vmem:[%s5223_s3 + $0x98] sm:$0x1]  ;;  %p4310_p4 = pnand %p4309_p3, %p4303_p0 }
  0x1e   :  { %3927 = vmatprep.subr.bf16.mxu0 %v3926_v47  ;;  %v3994_v48 = vpack.c.bf16 %v3115_v46, %v3114_v45  ;;  %v3088_v45 = vld [vmem:[%s5223_s3 + $0x20] sm:$0xff]  ;;  %v3089_v46 = vld [vmem:[%s5223_s3 + $0x28] sm:$0xff]  ;;  %v223_v6 = vld [vmem:[%s5225_s5 + $0x18] sm:$0xff] }
  0x1f   :  { %3989 = vmatpush3.bf16.msk.msra.mxu1 %vm4532_vm4, %v4565_v22 }
  0x20   :  { %3990 = vmatprep.subr.bf16.mxu1 %v4327_v62 }
  0x21   :  { %3929 = vmatpush1.bf16.msra.mxu0 %v3928_v52 }
  0x22   :  { %3931 = vmatprep.subr.bf16.mxu0 %v3930_v53  ;;  %v4005_v53 = vpack.c.bf16 %v3121_v50, %v3120_v49  ;;  %v3090_v49 = vld [vmem:[%s5223_s3 + $0x30] sm:$0xff]  ;;  %v3091_v50 = vld [vmem:[%s5223_s3 + $0x38] sm:$0x1] }
  0x25   :  { %3933 = vmatpush1.bf16.msra.mxu0 %v3932_v56 }
  0x26   :  { %3080 = vmatprep.subr.msk.mxu0 %vm94_vm1, %v74_v57 }
  0x29   :  { %3081 = vmatpush1.msk.msra.mxu0 %vm94_vm1, %v73_v58 }
  0x2a   :  { %166 = vmatmul.mubr.f32.vlgmr.msra.gmra.mrb[0].mxu0 %v33_v59  ;;  %3934 = vmatprep.subr.bf16.mxu0 %v4327_v62 }
  0x2b   :  { %3083 = vmatprep.mubr.msk.f32.mxu0 %vm87_vm0, %v36_v60  ;;  %3936 = vmatpush3.bf16.msra.mxu0 %v3935_v1 }
  0x2c   :  { %3937 = vmatprep.subr.bf16.mxu0 %v4327_v62 }
  0x2e   :  { %172 = vmatmul.mubr.f32.gmra.mrb[2].mxu0 %v35_v61  ;;  %v4008_v61 = vpack.c.bf16 %v3123_v55, %v3122_v54  ;;  %v3161_v54 = vld [vmem:[%s5223_s3 + $0x148] sm:$0xff] }
  0x2f   :  { %3940 = vmatpush3.bf16.msk.msra.mxu0 %vm4532_vm4, %v3938_v5  ;;  %3438 = vmatprep.mubr.msk.f32.mxu0 %vm4329_vm5, %v4330_v10 }
  0x30   :  { %3941 = vmatprep.subr.bf16.mxu0 %v4327_v62 }
  0x88   :  { %v80_v4 = vpop.permute.xlu0 %79 }
  0xfd   :  { %v167_v7 = vpop.f32.mrb[0].mxu0 }
  0xfe   :  { %v168_v8 = vadd.f32 %v167_v7, %v80_v4  ;;  %v169_v9 = vpop.f32.mrb[1].mxu0 }
  0xff   :  { %v170_v12 = vadd.f32 %v169_v9, %v80_v4  ;;  %v3128_v4 = vld [vmem:[%s5223_s3 + $0xc0] sm:$0xff]  ;;  %v3130_v9 = vld [vmem:[%s5223_s3 + $0xd0] sm:$0xff] }
 0x100   :  { %v178_v11 = vmax.f32 %v168_v8, 0.0 }
 0x101   :  { %v173_v13 = vpop.f32.mrb[2].mxu0  ;;  %v179_v15 = vmax.f32 %v170_v12, 0.0 }
 0x102   :  { %194 = vrot.lane.b32.xlu1 %v178_v11, %s4331_s17  ;;  %184 = vrot.lane.b32.xlu0 %v178_v11, %s4332_s18  ;;  %v175_v14 = vpop.f32.mrb[3].mxu0 }
 0x106   :  { %196 = vrot.lane.b32.xlu1 %v179_v15, %s4331_s17  ;;  %209 = vrot.lane.b32.xlu0 %v179_v15, %s4333_s19 }
 0x10a   :  { %84 = vperm.xlu1 %4301, %v76_v16  }
 0x174   :  { %v195_v23 = vpop.permute.xlu1 %194  ;;  %v185_v24 = vpop.permute.xlu0 %184 }
 0x175   :  { %v190_v25 = vadd.f32 %v185_v24, %v178_v11  ;;  %v3131_v11 = vld [vmem:[%s5223_s3 + $0xd8] sm:$0x1] }
 0x178   :  { %v197_v26 = vpop.permute.xlu1 %196  ;;  %v210_v29 = vpop.permute.xlu0 %209 }
 0x179   :  { %v203_v27 = vsel %vm202_vm6, %v195_v23, %v197_v26  ;;  %v3137_v23 = vld [vmem:[%s5223_s3 + $0xe8] sm:$0xff]  ;;  %v3139_v26 = vld [vmem:[%s5223_s3 + $0xf8] sm:$0x1] }
 0x17a   :  { %v207_v28 = vadd.f32 %v203_v27, %v190_v25  ;;  %v4033_v24 = vpack.c.bf16 %v3137_v23, %v3136_v21  ;;  %v3138_v25 = vld [vmem:[%s5223_s3 + $0xf0] sm:$0xff]  ;;  %v3177_v21 = vld [vmem:[%s5223_s3 + $0x188] sm:$0xff]  ;;  %v3179_v23 = vld [vmem:[%s5223_s3 + $0x198] sm:$0x1] }
 0x17c   :  { %v215_v30 = vadd.f32 %v210_v29, %v207_v28  ;;  %v4036_v28 = vpack.c.bf16 %v3139_v26, %v3138_v25  ;;  %v3144_v29 = vld [vmem:[%s5223_s3 + $0x100] sm:$0xff]  ;;  %v3187_v26 = vld [vmem:[%s5223_s3 + $0x1b8] sm:$0x1] }
 0x17e   :  { %v4573_v31 = vmul.f32 0.25, %v215_v30  ;;  %v3145_v30 = vld [vmem:[%s5223_s3 + $0x108] sm:$0xff] }
 0x180   :  { %3439 = vmatmul.mubr.msk.f32.vlgmr.msra.gmra.mrb[4].mxu0 %vm252_vm7, %v4573_v31  ;;  %v725_v32 = vrot.slane %v4573_v31, 3  ;;  %v882_v38 = vrot.slane %v4573_v31, 4  ;;  %v1039_v39 = vrot.slane %v4573_v31, 5  ;;  %v1196_v40 = vrot.slane %v4573_v31, 6 }
 0x181   :  { %3943 = vmatpush3.bf16.msra.mxu0 %v3935_v1  ;;  %3449 = vmatprep.mubr.msk.f32.mxu0 %vm4329_vm5, %v4330_v10  ;;  %v1353_v41 = vrot.slane %v4573_v31, 7  ;;  %v411_v15 = vrot.slane %v4573_v31, 1  ;;  %v568_v17 = vrot.slane %v4573_v31, 2 }
 0x182   :  { %802 = vrot.lane.b32.xlu0 %v725_v32, %s4334_s2  ;;  %3944 = vmatprep.subr.bf16.mxu0 %v4327_v62 }
 0x185   :  { %3947 = vmatpush3.bf16.msk.msra.mxu0 %vm4532_vm4, %v3938_v5  ;;  %v3129_v5 = vld [vmem:[%s5223_s3 + $0xc8] sm:$0xff] }
 0x186   :  { %3948 = vmatprep.subr.bf16.mxu0 %v4327_v62  ;;  %v4019_v8 = vpack.c.bf16 %v3129_v5, %v3128_v4 }
 0x189   :  { %v85_v33 = vpop.permute.xlu1 %84 }
 0x18a   :  { %v174_v34 = vadd.f32 %v173_v13, %v85_v33  ;;  %v176_v35 = vadd.f32 %v175_v14, %v85_v33  ;;  %v4022_v14 = vpack.c.bf16 %v3131_v11, %v3130_v9  ;;  %v4047_v33 = vpack.c.bf16 %v3145_v30, %v3144_v29  ;;  %v3169_v9 = vld [vmem:[%s5223_s3 + $0x168] sm:$0xff]  ;;  %v3170_v11 = vld [vmem:[%s5223_s3 + $0x170] sm:$0xff]  ;;  %v3192_v29 = vld [vmem:[%s5223_s3 + $0x1c0] sm:$0xff] }
 0x18b   :  { %v3193_v30 = vld [vmem:[%s5223_s3 + $0x1c8] sm:$0xff] }
 0x18c   :  { %v180_v36 = vmax.f32 %v174_v34, 0.0  ;;  %v181_v37 = vmax.f32 %v176_v35, 0.0  ;;  %v3146_v34 = vld [vmem:[%s5223_s3 + $0x110] sm:$0xff]  ;;  %v3147_v35 = vld [vmem:[%s5223_s3 + $0x118] sm:$0x1] }
 0x18e   :  { %186 = vrot.lane.b32.xlu1 %v180_v36, %s4332_s18  ;;  %198 = vrot.lane.b32.xlu0 %v180_v36, %s4331_s17 }
 0x192   :  { %200 = vrot.lane.b32.xlu1 %v181_v37, %s4331_s17  ;;  %959 = vrot.lane.b32.xlu0 %v882_v38, %s4334_s2 }
 0x196   :  { %211 = vrot.lane.b32.xlu1 %v181_v37, %s4333_s19  ;;  %1116 = vrot.lane.b32.xlu0 %v1039_v39, %s4334_s2  ;;  %v4050_v37 = vpack.c.bf16 %v3147_v35, %v3146_v34  ;;  %v3195_v34 = vld [vmem:[%s5223_s3 + $0x1d8] sm:$0x1] }
 0x19a   :  { %1273 = vrot.lane.b32.xlu1 %v1196_v40, %s4334_s2  ;;  %1430 = vrot.lane.b32.xlu0 %v1353_v41, %s4334_s2 }
 0x1f4   :  { %v803_v47 = vpop.permute.xlu0 %802 }
 0x1f5   :  { %3516 = vmatmul.mubr.msk.f32.vlgmr.msra.gmra.mrb[0].mxu1 %vm252_vm7, %v803_v47 }
 0x1f6   :  { %3992 = vmatpush3.bf16.msra.mxu1 %v3991_v44  ;;  %3526 = vmatprep.mubr.msk.f32.mxu1 %vm4329_vm5, %v4330_v10 }
 0x1f7   :  { %3993 = vmatprep.subr.bf16.mxu1 %v4327_v62 }
 0x1fa   :  { %3996 = vmatpush3.bf16.msk.msra.mxu1 %vm4532_vm4, %v3994_v48 }
 0x1fb   :  { %3997 = vmatprep.subr.bf16.mxu1 %v4327_v62 }
 0x1fd   :  { %3527 = vmatmul.mubr.msk.f32.vlgmr.msra.gmra.mrb[2].mxu1 %vm252_vm7, %v882_v38  ;;  %v3152_v38 = vld [vmem:[%s5223_s3 + $0x120] sm:$0xff] }
 0x1fe   :  { %3999 = vmatpush3.bf16.msra.mxu1 %v3991_v44  ;;  %3537 = vmatprep.mubr.msk.f32.mxu1 %vm4329_vm5, %v4330_v10 }
 0x1ff   :  { %4000 = vmatprep.subr.bf16.mxu1 %v4327_v62 }
 0x200   :  { %v187_v51 = vpop.permute.xlu1 %186  ;;  %v199_v52 = vpop.permute.xlu0 %198 }
 0x201   :  { %v191_v56 = vadd.f32 %v187_v51, %v180_v36 }
 0x202   :  { %4003 = vmatpush3.bf16.msk.msra.mxu1 %vm4532_vm4, %v3994_v48  ;;  %v3949_v48 = vpack.c.bf16 %v3089_v46, %v3088_v45 }
 0x203   :  { %4004 = vmatprep.subr.bf16.mxu1 %v4327_v62 }
 0x204   :  { %v201_v57 = vpop.permute.xlu1 %200  ;;  %v960_v58 = vpop.permute.xlu0 %959 }
 0x205   :  { %v204_v59 = vsel %vm202_vm6, %v199_v52, %v201_v57  ;;  %3538 = vmatmul.mubr.msk.f32.vlgmr.msra.gmra.mrb[0].mxu1 %vm252_vm7, %v960_v58  ;;  %v3952_v52 = vpack.c.bf16 %v3091_v50, %v3090_v49  ;;  %v3163_v57 = vld [vmem:[%s5223_s3 + $0x158] sm:$0x1]  ;;  %v226_v50 = vld [vmem:[%s5225_s5 + $0x30] sm:$0xff] }
 0x206   :  { %4006 = vmatpush3.bf16.msra.mxu1 %v4005_v53  ;;  %v208_v60 = vadd.f32 %v204_v59, %v191_v56  ;;  %3548 = vmatprep.mubr.msk.f32.mxu1 %vm4329_vm5, %v4330_v10  ;;  %v3162_v56 = vld [vmem:[%s5223_s3 + $0x150] sm:$0xff] }
 0x207   :  { %4007 = vmatprep.subr.bf16.mxu1 %v4327_v62  ;;  %v4078_v59 = vpack.c.bf16 %v3163_v57, %v3162_v56  ;;  %v230_v56 = vld [vmem:[%s5225_s5 + $0x50] sm:$0xff]  ;;  %v231_v57 = vld [vmem:[%s5225_s5 + $0x58] sm:$0xff] }
 0x208   :  { %v212_v63 = vpop.permute.xlu1 %211  ;;  %v1117_v12 = vpop.permute.xlu0 %1116 }
 0x209   :  { %v216_v0 = vadd.f32 %v212_v63, %v208_v60  ;;  %v3096_v60 = vld [vmem:[%s5223_s3 + $0x40] sm:$0xff] }
 0x20a   :  { %4010 = vmatpush3.bf16.msk.msra.mxu1 %vm4532_vm4, %v4008_v61 }
 0x20b   :  { %v4648_v1 = vmul.f32 0.25, %v216_v0  ;;  %4011 = vmatprep.subr.bf16.mxu1 %v4327_v62  ;;  %v3098_v0 = vld [vmem:[%s5223_s3 + $0x50] sm:$0xff] }
 0x20c   :  { %v1274_v27 = vpop.permute.xlu1 %1273  ;;  %v1431_v36 = vpop.permute.xlu0 %1430 }
 0x20d   :  { %3549 = vmatmul.mubr.msk.f32.vlgmr.msra.gmra.mrb[2].mxu1 %vm252_vm7, %v1039_v39  ;;  %1587 = vrot.lane.b32.xlu1 %v4648_v1, %s4334_s2  ;;  %v1667_v2 = vrot.slane %v4648_v1, 1  ;;  %v1824_v3 = vrot.slane %v4648_v1, 2  ;;  %v1981_v7 = vrot.slane %v4648_v1, 3  ;;  %v2138_v13 = vrot.slane %v4648_v1, 4  ;;  %v3153_v39 = vld [vmem:[%s5223_s3 + $0x128] sm:$0xff] }
 0x20e   :  { %4013 = vmatpush3.bf16.msra.mxu1 %v4005_v53  ;;  %3559 = vmatprep.mubr.msk.f32.mxu1 %vm4329_vm5, %v4330_v10  ;;  %v2295_v16 = vrot.slane %v4648_v1, 5  ;;  %v2452_v18 = vrot.slane %v4648_v1, 6  ;;  %v2609_v19 = vrot.slane %v4648_v1, 7  ;;  %v3160_v53 = vld [vmem:[%s5223_s3 + $0x140] sm:$0xff] }
 0x20f   :  { %1744 = vrot.lane.b32.xlu0 %v1667_v2, %s4334_s2  ;;  %4014 = vmatprep.subr.bf16.mxu1 %v4327_v62  ;;  %v4075_v55 = vpack.c.bf16 %v3161_v54, %v3160_v53  ;;  %v228_v53 = vld [vmem:[%s5225_s5 + $0x40] sm:$0xff]  ;;  %v229_v54 = vld [vmem:[%s5225_s5 + $0x48] sm:$0xff] }
 0x211   :  { %1901 = vrot.lane.b32.xlu1 %v1824_v3, %s4334_s2 }
 0x212   :  { %4017 = vmatpush3.bf16.msk.msra.mxu1 %vm4532_vm4, %v4008_v61  ;;  %v3097_v61 = vld [vmem:[%s5223_s3 + $0x48] sm:$0xff] }
 0x213   :  { %2058 = vrot.lane.b32.xlu0 %v1981_v7, %s4334_s2  ;;  %4018 = vmatprep.subr.bf16.mxu1 %v4327_v62  ;;  %v3963_v63 = vpack.c.bf16 %v3097_v61, %v3096_v60  ;;  %v233_v60 = vld [vmem:[%s5225_s5 + $0x68] sm:$0xff] }
 0x215   :  { %3560 = vmatmul.mubr.msk.f32.vlgmr.msra.gmra.mrb[0].mxu1 %vm252_vm7, %v1117_v12  ;;  %331 = vrot.lane.b32.xlu1 %v4573_v31, %s4334_s2  ;;  %v3171_v12 = vld [vmem:[%s5223_s3 + $0x178] sm:$0x1]  ;;  %v3184_v31 = vld [vmem:[%s5223_s3 + $0x1a0] sm:$0xff] }
 0x216   :  { %4020 = vmatpush3.bf16.msra.mxu1 %v4019_v8  ;;  %3570 = vmatprep.mubr.msk.f32.mxu1 %vm4329_vm5, %v4330_v10 }
 0x217   :  { %2215 = vrot.lane.b32.xlu0 %v2138_v13, %s4334_s2  ;;  %4021 = vmatprep.subr.bf16.mxu1 %v4327_v62 }
 0x219   :  { %488 = vrot.lane.b32.xlu1 %v411_v15, %s4334_s2 }
 0x21a   :  { %4024 = vmatpush3.bf16.msk.msra.mxu1 %vm4532_vm4, %v4022_v14 }
 0x21b   :  { %2372 = vrot.lane.b32.xlu0 %v2295_v16, %s4334_s2  ;;  %4025 = vmatprep.subr.bf16.mxu1 %v4327_v62 }
 0x21d   :  { %3571 = vmatmul.mubr.msk.f32.vlgmr.msra.gmra.mrb[2].mxu1 %vm252_vm7, %v1196_v40  ;;  %645 = vrot.lane.b32.xlu1 %v568_v17, %s4334_s2  ;;  %v4061_v40 = vpack.c.bf16 %v3153_v39, %v3152_v38  ;;  %v3201_v38 = vld [vmem:[%s5223_s3 + $0x1e8] sm:$0xff] }
 0x21e   :  { %4027 = vmatpush3.bf16.msra.mxu1 %v4019_v8  ;;  %3581 = vmatprep.mubr.msk.f32.mxu1 %vm4329_vm5, %v4330_v10  ;;  %v3168_v8 = vld [vmem:[%s5223_s3 + $0x160] sm:$0xff] }
 0x21f   :  { %2529 = vrot.lane.b32.xlu0 %v2452_v18, %s4334_s2  ;;  %4028 = vmatprep.subr.bf16.mxu1 %v4327_v62 }
 0x221   :  { %2686 = vrot.lane.b32.xlu1 %v2609_v19, %s4334_s2 }
 0x222   :  { %4031 = vmatpush3.bf16.msk.msra.mxu1 %vm4532_vm4, %v4022_v14  ;;  %v4092_v14 = vpack.c.bf16 %v3171_v12, %v3170_v11  ;;  %v236_v11 = vld [vmem:[%s5227_s7] sm:$0xff]  ;;  %v237_v12 = vld [vmem:[%s5227_s7 + $0x8] sm:$0xff] }
 0x223   :  { %4032 = vmatprep.subr.bf16.mxu1 %v4327_v62 }
 0x225   :  { %3582 = vmatmul.mubr.msk.f32.vlgmr.msra.gmra.mrb[0].mxu1 %vm252_vm7, %v1274_v27 }
 0x226   :  { %4034 = vmatpush3.bf16.msra.mxu1 %v4033_v24  ;;  %3592 = vmatprep.mubr.msk.f32.mxu1 %vm4329_vm5, %v4330_v10 }
 0x227   :  { %4035 = vmatprep.subr.bf16.mxu1 %v4327_v62 }
 0x22a   :  { %4038 = vmatpush3.bf16.msk.msra.mxu1 %vm4532_vm4, %v4036_v28 }
 0x22b   :  { %4039 = vmatprep.subr.bf16.mxu1 %v4327_v62 }
 0x22d   :  { %3593 = vmatmul.mubr.msk.f32.vlgmr.msra.gmra.mrb[2].mxu1 %vm252_vm7, %v1353_v41  ;;  %v3154_v41 = vld [vmem:[%s5223_s3 + $0x130] sm:$0xff] }
 0x22e   :  { %4041 = vmatpush3.bf16.msra.mxu1 %v4033_v24  ;;  %3603 = vmatprep.mubr.msk.f32.mxu1 %vm4329_vm5, %v4330_v10  ;;  %v4064_v44 = vpack.c.bf16 %v3155_v42, %v3154_v41 }
 0x22f   :  { %4042 = vmatprep.subr.bf16.mxu1 %v4327_v62 }
 0x232   :  { %4045 = vmatpush3.bf16.msk.msra.mxu1 %vm4532_vm4, %v4036_v28 }
 0x233   :  { %4046 = vmatprep.subr.bf16.mxu1 %v4327_v62 }
 0x235   :  { %3604 = vmatmul.mubr.msk.f32.vlgmr.msra.gmra.mrb[0].mxu1 %vm252_vm7, %v1431_v36 }
 0x236   :  { %4048 = vmatpush3.bf16.msra.mxu1 %v4047_v33  ;;  %3614 = vmatprep.mubr.msk.f32.mxu1 %vm4329_vm5, %v4330_v10 }
 0x237   :  { %4049 = vmatprep.subr.bf16.mxu1 %v4327_v62 }
 0x23a   :  { %4052 = vmatpush3.bf16.msk.msra.mxu1 %vm4532_vm4, %v4050_v37 }
 0x23b   :  { %4053 = vmatprep.subr.bf16.mxu1 %v4327_v62 }
 0x23d   :  { %3615 = vmatmul.mubr.msk.f32.vlgmr.msra.gmra.mrb[2].mxu1 %vm252_vm7, %v4648_v1  ;;  %v221_v1 = vld [vmem:[%s5225_s5 + $0x8] sm:$0xff] }
 0x23e   :  { %4055 = vmatpush3.bf16.msra.mxu1 %v4047_v33  ;;  %3625 = vmatprep.mubr.msk.f32.mxu1 %vm4329_vm5, %v4330_v10  ;;  %v4131_v33 = vpack.c.bf16 %v3193_v30, %v3192_v29  ;;  %v244_v30 = vld [vmem:[%s5227_s7 + $0x40] sm:$0xff] }
 0x23f   :  { %4056 = vmatprep.subr.bf16.mxu1 %v4327_v62 }
 0x242   :  { %4059 = vmatpush3.bf16.msk.msra.mxu1 %vm4532_vm4, %v4050_v37  ;;  %v3200_v37 = vld [vmem:[%s5223_s3 + $0x1e0] sm:$0xff] }
 0x243   :  { %4060 = vmatprep.subr.bf16.mxu1 %v4327_v62  ;;  %v4145_v39 = vpack.c.bf16 %v3201_v38, %v3200_v37 }
 0x27f   :  { %v1588_v43 = vpop.permute.xlu1 %1587 }
 0x280   :  { %3626 = vmatmul.mubr.msk.f32.vlgmr.msra.gmra.mrb[0].mxu1 %vm252_vm7, %v1588_v43 }
 0x281   :  { %4062 = vmatpush3.bf16.msra.mxu1 %v4061_v40  ;;  %3636 = vmatprep.mubr.msk.f32.mxu1 %vm4329_vm5, %v4330_v10  ;;  %v1745_v58 = vpop.permute.xlu0 %1744 }
 0x282   :  { %4063 = vmatprep.subr.bf16.mxu1 %v4327_v62 }
 0x283   :  { %v4803_v47 = vpop.permute.xlu1 %1901 }
 0x285   :  { %4066 = vmatpush3.bf16.msk.msra.mxu1 %vm4532_vm4, %v4064_v44  ;;  %v2059_v24 = vpop.permute.xlu0 %2058 }
 0x286   :  { %4067 = vmatprep.subr.bf16.mxu1 %v4327_v62 }
 0x287   :  { %v332_v51 = vpop.permute.xlu1 %331 }
 0x288   :  { %3637 = vmatmul.mubr.msk.f32.vlgmr.msra.gmra.mrb[2].mxu1 %vm252_vm7, %v1667_v2  ;;  %3450 = vmatmul.mubr.msk.f32.vlgmr.msra.gmra.mrb[6].mxu0 %vm252_vm7, %v332_v51  ;;  %v3099_v2 = vld [vmem:[%s5223_s3 + $0x58] sm:$0x1] }
 0x289   :  { %3950 = vmatpush3.bf16.msra.mxu0 %v3949_v48  ;;  %4069 = vmatpush3.bf16.msra.mxu1 %v4061_v40  ;;  %v3966_v5 = vpack.c.bf16 %v3099_v2, %v3098_v0  ;;  %v2216_v27 = vpop.permute.xlu0 %2215  ;;  %v3203_v40 = vld [vmem:[%s5223_s3 + $0x1f8] sm:$0x1]  ;;  %v219_v0 = vld [vmem:[%s5224_s4] sm:$0x1] }
 0x28a   :  { %4070 = vmatprep.subr.bf16.mxu1 %v4327_v62  ;;  %3951 = vmatprep.subr.bf16.mxu0 %v4327_v62  ;;  %v227_v51 = vld [vmem:[%s5225_s5 + $0x38] sm:$0xff] }
 0x28b   :  { %3460 = vmatprep.mubr.msk.f32.mxu0 %vm4329_vm5, %v4330_v10  ;;  %3647 = vmatprep.mubr.msk.f32.mxu1 %vm4329_vm5, %v4330_v10  ;;  %v489_v4 = vpop.permute.xlu1 %488 }
 0x28d   :  { %3954 = vmatpush3.bf16.msk.msra.mxu0 %vm4532_vm4, %v3952_v52  ;;  %4073 = vmatpush3.bf16.msk.msra.mxu1 %vm4532_vm4, %v4064_v44  ;;  %v2373_v35 = vpop.permute.xlu0 %2372  ;;  %v220_v44 = vld [vmem:[%s5225_s5] sm:$0xff] }
 0x28e   :  { %4074 = vmatprep.subr.bf16.mxu1 %v4327_v62  ;;  %3955 = vmatprep.subr.bf16.mxu0 %v4327_v62  ;;  %v5059_v45 = vpack.c.bf16 %v221_v1, %v220_v44 }
 0x290   :  { %3648 = vmatmul.mubr.msk.f32.vlgmr.msra.gmra.mrb[0].mxu1 %vm252_vm7, %v1745_v58  ;;  %3461 = vmatmul.mubr.msk.f32.vlgmr.msra.gmra.mrb[4].mxu0 %vm252_vm7, %v411_v15  ;;  %v646_v15 = vpop.permute.xlu1 %645  ;;  %v5105_v58 = vpack.c.bf16 %v231_v57, %v230_v56 }
 0x291   :  { %3957 = vmatpush3.bf16.msra.mxu0 %v3949_v48  ;;  %4076 = vmatpush3.bf16.msra.mxu1 %v4075_v55  ;;  %v2530_v41 = vpop.permute.xlu0 %2529  ;;  %v225_v48 = vld [vmem:[%s5225_s5 + $0x28] sm:$0xff] }
 0x292   :  { %4077 = vmatprep.subr.bf16.mxu1 %v4327_v62  ;;  %3958 = vmatprep.subr.bf16.mxu0 %v4327_v62 }
 0x293   :  { %3471 = vmatprep.mubr.msk.f32.mxu0 %vm4329_vm5, %v4330_v10  ;;  %3658 = vmatprep.mubr.msk.f32.mxu1 %vm4329_vm5, %v4330_v10 }
 0x294   :  { %v2687_v43 = vpop.permute.xlu1 %2686 }
 0x295   :  { %3961 = vmatpush3.bf16.msk.msra.mxu0 %vm4532_vm4, %v3952_v52  ;;  %4080 = vmatpush3.bf16.msk.msra.mxu1 %vm4532_vm4, %v4078_v59  ;;  %v5085_v52 = vpack.c.bf16 %v227_v51, %v226_v50 }
 0x296   :  { %3962 = vmatprep.subr.bf16.mxu0 %v4327_v62  ;;  %4081 = vmatprep.subr.bf16.mxu1 %v4327_v62 }
 0x298   :  { %3472 = vmatmul.mubr.msk.f32.vlgmr.msra.gmra.mrb[6].mxu0 %vm252_vm7, %v489_v4  ;;  %3659 = vmatmul.mubr.msk.f32.vlgmr.msra.gmra.mrb[2].mxu1 %vm252_vm7, %v1824_v3  ;;  %v4089_v3 = vpack.c.bf16 %v3169_v9, %v3168_v8 }
 0x299   :  { %3964 = vmatpush3.bf16.msra.mxu0 %v3963_v63  ;;  %4083 = vmatpush3.bf16.msra.mxu1 %v4075_v55  ;;  %v5095_v55 = vpack.c.bf16 %v229_v54, %v228_v53 }
 0x29a   :  { %3965 = vmatprep.subr.bf16.mxu0 %v4327_v62  ;;  %4084 = vmatprep.subr.bf16.mxu1 %v4327_v62 }
 0x29b   :  { %3482 = vmatprep.mubr.msk.f32.mxu0 %vm4329_vm5, %v4330_v10  ;;  %3669 = vmatprep.mubr.msk.f32.mxu1 %vm4329_vm5, %v4330_v10 }
 0x29d   :  { %3968 = vmatpush3.bf16.msk.msra.mxu0 %vm4532_vm4, %v3966_v5  ;;  %4087 = vmatpush3.bf16.msk.msra.mxu1 %vm4532_vm4, %v4078_v59  ;;  %v232_v59 = vld [vmem:[%s5225_s5 + $0x60] sm:$0xff] }
 0x29e   :  { %3969 = vmatprep.subr.bf16.mxu0 %v4327_v62  ;;  %4088 = vmatprep.subr.bf16.mxu1 %v4327_v62  ;;  %v5116_v61 = vpack.c.bf16 %v233_v60, %v232_v59 }
 0x2a0   :  { %3483 = vmatmul.mubr.msk.f32.vlgmr.msra.gmra.mrb[4].mxu0 %vm252_vm7, %v568_v17  ;;  %3670 = vmatmul.mubr.msk.f32.vlgmr.msra.gmra.mrb[0].mxu1 %vm252_vm7, %v4803_v47  ;;  %v3176_v17 = vld [vmem:[%s5223_s3 + $0x180] sm:$0xff] }
 0x2a1   :  { %3971 = vmatpush3.bf16.msra.mxu0 %v3963_v63  ;;  %4090 = vmatpush3.bf16.msra.mxu1 %v4089_v3  ;;  %v224_v47 = vld [vmem:[%s5225_s5 + $0x20] sm:$0xff]  ;;  %v5123_v63 = vld [vmem:[%s5225_s5 + $0x70] sm:$0xff] }
 0x2a2   :  { %3972 = vmatprep.subr.bf16.mxu0 %v4327_v62  ;;  %4091 = vmatprep.subr.bf16.mxu1 %v4327_v62  ;;  %v5075_v49 = vpack.c.bf16 %v225_v48, %v224_v47 }
 0x2a3   :  { %3493 = vmatprep.mubr.msk.f32.mxu0 %vm4329_vm5, %v4330_v10  ;;  %3680 = vmatprep.mubr.msk.f32.mxu1 %vm4329_vm5, %v4330_v10 }
 0x2a5   :  { %3975 = vmatpush3.bf16.msk.msra.mxu0 %vm4532_vm4, %v3966_v5  ;;  %4094 = vmatpush3.bf16.msk.msra.mxu1 %vm4532_vm4, %v4092_v14 }
 0x2a6   :  { %3976 = vmatprep.subr.bf16.mxu0 %v4327_v62  ;;  %4095 = vmatprep.subr.bf16.mxu1 %v4327_v62 }
 0x2a8   :  { %3494 = vmatmul.mubr.msk.f32.vlgmr.msra.gmra.mrb[6].mxu0 %vm252_vm7, %v646_v15  ;;  %3681 = vmatmul.mubr.msk.f32.vlgmr.msra.gmra.mrb[2].mxu1 %vm252_vm7, %v1981_v7  ;;  %v3178_v7 = vld [vmem:[%s5223_s3 + $0x190] sm:$0xff] }
 0x2a9   :  { %3978 = vmatpush3.bf16.msra.mxu0 %v4559_v20  ;;  %4097 = vmatpush3.bf16.msra.mxu1 %v4089_v3  ;;  %v4103_v20 = vpack.c.bf16 %v3177_v21, %v3176_v17  ;;  %v4180_v21 = vpack.c.bf16 %v237_v12, %v236_v11 }
 0x2aa   :  { %3979 = vmatprep.subr.bf16.mxu0 %v4327_v62  ;;  %4098 = vmatprep.subr.bf16.mxu1 %v4327_v62 }
 0x2ab   :  { %3504 = vmatprep.mubr.msk.f32.mxu0 %vm4329_vm5, %v4330_v10  ;;  %3691 = vmatprep.mubr.msk.f32.mxu1 %vm4329_vm5, %v4330_v10 }
 0x2ad   :  { %3982 = vmatpush3.bf16.msk.msra.mxu0 %vm4532_vm4, %v4565_v22  ;;  %4101 = vmatpush3.bf16.msk.msra.mxu1 %vm4532_vm4, %v4092_v14  ;;  %v4106_v22 = vpack.c.bf16 %v3179_v23, %v3178_v7  ;;  %v238_v7 = vld [vmem:[%s5227_s7 + $0x10] sm:$0xff]  ;;  %v239_v23 = vld [vmem:[%s5227_s7 + $0x18] sm:$0xff] }
 0x2ae   :  { %4102 = vmatprep.subr.bf16.mxu1 %v4327_v62  ;;  %4158 = vmatprep.subr.bf16.mxu0 %v4327_v62 }
 0x2b0   :  { %3505 = vmatmul.mubr.msk.f32.vlgmr.msra.gmra.mrb[4].mxu0 %vm252_vm7, %v725_v32  ;;  %3692 = vmatmul.mubr.msk.f32.vlgmr.msra.gmra.mrb[0].mxu1 %vm252_vm7, %v2059_v24  ;;  %v3185_v32 = vld [vmem:[%s5223_s3 + $0x1a8] sm:$0xff]  ;;  %v4183_v24 = vpack.c.bf16 %v239_v23, %v238_v7 }
 0x2b1   :  { %4104 = vmatpush3.bf16.msra.mxu1 %v4103_v20  ;;  %3702 = vmatprep.mubr.msk.f32.mxu1 %vm4329_vm5, %v4330_v10  ;;  %v4117_v25 = vpack.c.bf16 %v3185_v32, %v3184_v31  ;;  %v241_v31 = vld [vmem:[%s5227_s7 + $0x28] sm:$0xff] }
 0x2b2   :  { %4105 = vmatprep.subr.bf16.mxu1 %v4327_v62  ;;  %3812 = vmatprep.mubr.msk.f32.mxu0 %vm4329_vm5, %v4330_v10 }
 0x2b3   :  { %4160 = vmatpush3.bf16.msra.mxu0 %v5059_v45 }
 0x2b4   :  { %4161 = vmatprep.subr.bf16.mxu0 %v4327_v62 }
 0x2b5   :  { %4108 = vmatpush3.bf16.msk.msra.mxu1 %vm4532_vm4, %v4106_v22 }
 0x2b6   :  { %4109 = vmatprep.subr.bf16.mxu1 %v4327_v62 }
 0x2b8   :  { %3703 = vmatmul.mubr.msk.f32.vlgmr.msra.gmra.mrb[2].mxu1 %vm252_vm7, %v2138_v13  ;;  %v3186_v13 = vld [vmem:[%s5223_s3 + $0x1b0] sm:$0xff] }
 0x2b9   :  { %4111 = vmatpush3.bf16.msra.mxu1 %v4103_v20  ;;  %3713 = vmatprep.mubr.msk.f32.mxu1 %vm4329_vm5, %v4330_v10  ;;  %v4120_v28 = vpack.c.bf16 %v3187_v26, %v3186_v13 }
 0x2ba   :  { %4112 = vmatprep.subr.bf16.mxu1 %v4327_v62 }
 0x2bd   :  { %4115 = vmatpush3.bf16.msk.msra.mxu1 %vm4532_vm4, %v4106_v22  ;;  %v240_v22 = vld [vmem:[%s5227_s7 + $0x20] sm:$0xff] }
 0x2be   :  { %4116 = vmatprep.subr.bf16.mxu1 %v4327_v62  ;;  %v4186_v26 = vpack.c.bf16 %v241_v31, %v240_v22 }
 0x2c0   :  { %3714 = vmatmul.mubr.msk.f32.vlgmr.msra.gmra.mrb[0].mxu1 %vm252_vm7, %v2216_v27  ;;  %v242_v27 = vld [vmem:[%s5227_s7 + $0x30] sm:$0xff] }
 0x2c1   :  { %4118 = vmatpush3.bf16.msra.mxu1 %v4117_v25  ;;  %3724 = vmatprep.mubr.msk.f32.mxu1 %vm4329_vm5, %v4330_v10 }
 0x2c2   :  { %4119 = vmatprep.subr.bf16.mxu1 %v4327_v62 }
 0x2c5   :  { %4122 = vmatpush3.bf16.msk.msra.mxu1 %vm4532_vm4, %v4120_v28 }
 0x2c6   :  { %4123 = vmatprep.subr.bf16.mxu1 %v4327_v62 }
 0x2c8   :  { %3725 = vmatmul.mubr.msk.f32.vlgmr.msra.gmra.mrb[2].mxu1 %vm252_vm7, %v2295_v16  ;;  %v3194_v16 = vld [vmem:[%s5223_s3 + $0x1d0] sm:$0xff] }
 0x2c9   :  { %4125 = vmatpush3.bf16.msra.mxu1 %v4117_v25  ;;  %3735 = vmatprep.mubr.msk.f32.mxu1 %vm4329_vm5, %v4330_v10  ;;  %v4134_v36 = vpack.c.bf16 %v3195_v34, %v3194_v16  ;;  %v246_v34 = vld [vmem:[%s5227_s7 + $0x50] sm:$0xf] }
 0x2ca   :  { %4126 = vmatprep.subr.bf16.mxu1 %v4327_v62 }
 0x2cd   :  { %4129 = vmatpush3.bf16.msk.msra.mxu1 %vm4532_vm4, %v4120_v28  ;;  %v243_v28 = vld [vmem:[%s5227_s7 + $0x38] sm:$0xff] }
 0x2ce   :  { %4130 = vmatprep.subr.bf16.mxu1 %v4327_v62  ;;  %v4189_v29 = vpack.c.bf16 %v243_v28, %v242_v27 }
 0x2d0   :  { %3736 = vmatmul.mubr.msk.f32.vlgmr.msra.gmra.mrb[0].mxu1 %vm252_vm7, %v2373_v35  ;;  %v235_v35 = vld [vmem:[%s5226_s6] sm:$0x1] }
 0x2d1   :  { %4132 = vmatpush3.bf16.msra.mxu1 %v4131_v33  ;;  %3746 = vmatprep.mubr.msk.f32.mxu1 %vm4329_vm5, %v4330_v10 }
 0x2d2   :  { %4133 = vmatprep.subr.bf16.mxu1 %v4327_v62 }
 0x2d5   :  { %4136 = vmatpush3.bf16.msk.msra.mxu1 %vm4532_vm4, %v4134_v36 }
 0x2d6   :  { %4137 = vmatprep.subr.bf16.mxu1 %v4327_v62 }
 0x2d8   :  { %3747 = vmatmul.mubr.msk.f32.vlgmr.msra.gmra.mrb[2].mxu1 %vm252_vm7, %v2452_v18  ;;  %v3202_v18 = vld [vmem:[%s5223_s3 + $0x1f0] sm:$0xff] }
 0x2d9   :  { %4139 = vmatpush3.bf16.msra.mxu1 %v4131_v33  ;;  %3757 = vmatprep.mubr.msk.f32.mxu1 %vm4329_vm5, %v4330_v10  ;;  %v4148_v42 = vpack.c.bf16 %v3203_v40, %v3202_v18  ;;  %v245_v33 = vld [vmem:[%s5227_s7 + $0x48] sm:$0xff]  ;;  %v247_v40 = vld [vmem:[%s5228_s8] sm:$0x1] }
 0x2da   :  { %4140 = vmatprep.subr.bf16.mxu1 %v4327_v62  ;;  %v4192_v16 = vpack.c.bf16 %v245_v33, %v244_v30 }
 0x2dd   :  { %4143 = vmatpush3.bf16.msk.msra.mxu1 %vm4532_vm4, %v4134_v36 }
 0x2de   :  { %4144 = vmatprep.subr.bf16.mxu1 %v4327_v62 }
 0x2e0   :  { %3758 = vmatmul.mubr.msk.f32.vlgmr.msra.gmra.mrb[0].mxu1 %vm252_vm7, %v2530_v41 }
 0x2e1   :  { %4146 = vmatpush3.bf16.msra.mxu1 %v4145_v39  ;;  %3768 = vmatprep.mubr.msk.f32.mxu1 %vm4329_vm5, %v4330_v10 }
 0x2e2   :  { %4147 = vmatprep.subr.bf16.mxu1 %v4327_v62 }
 0x2e5   :  { %4150 = vmatpush3.bf16.msk.msra.mxu1 %vm4532_vm4, %v4148_v42 }
 0x2e6   :  { %4151 = vmatprep.subr.bf16.mxu1 %v4327_v62 }
 0x2e8   :  { %3769 = vmatmul.mubr.msk.f32.vlgmr.msra.gmra.mrb[2].mxu1 %vm252_vm7, %v2609_v19  ;;  %v222_v19 = vld [vmem:[%s5225_s5 + $0x10] sm:$0xff] }
 0x2e9   :  { %4153 = vmatpush3.bf16.msra.mxu1 %v4145_v39  ;;  %3779 = vmatprep.mubr.msk.f32.mxu1 %vm4329_vm5, %v4330_v10  ;;  %v5065_v46 = vpack.c.bf16 %v223_v6, %v222_v19 }
 0x2ea   :  { %4154 = vmatprep.subr.bf16.mxu1 %v4327_v62 }
 0x2eb   :  { %4163 = vmatpush3.bf16.msra.mxu0 %v5065_v46 }
 0x2ec   :  { %4164 = vmatprep.subr.bf16.mxu0 %v4327_v62 }
 0x2ed   :  { %4157 = vmatpush3.bf16.msk.msra.mxu1 %vm4532_vm4, %v4148_v42 }
 0x2ef   :  { %4166 = vmatpush3.bf16.msra.mxu0 %v5075_v49 }
 0x2f0   :  { %3780 = vmatmul.mubr.msk.f32.vlgmr.msra.gmra.mrb[0].mxu1 %vm252_vm7, %v2687_v43  ;;  %4167 = vmatprep.subr.bf16.mxu0 %v4327_v62 }
 0x2f3   :  { %4169 = vmatpush3.bf16.msra.mxu0 %v5085_v52 }
 0x2f4   :  { %4170 = vmatprep.subr.bf16.mxu0 %v4327_v62 }
 0x2f7   :  { %4172 = vmatpush3.bf16.msra.mxu0 %v5095_v55 }
 0x2f8   :  { %4173 = vmatprep.subr.bf16.mxu0 %v4327_v62 }
 0x2fb   :  { %4175 = vmatpush3.bf16.msra.mxu0 %v5105_v58 }
 0x2fc   :  { %4176 = vmatprep.subr.bf16.mxu0 %v4327_v62 }
 0x2ff   :  { %4178 = vmatpush3.bf16.msra.mxu0 %v5116_v61 }
 0x300   :  { %3810 = vmatprep.subr.mxu0 %v4330_v10 }
 0x303   :  { %3811 = vmatpush3.msra.mxu0 %v5123_v63 }
 0x304   :  { %4179 = vmatprep.subr.bf16.mxu0 %v4327_v62 }
 0x37b   :  { %v715_v2 = vpop.f32.mrb[6].mxu0 }
 0x37c   :  { %v4232_v4 = vadd.f32 %v715_v2, %v219_v0  ;;  %v3495_v5 = vpop.f32.mrb[7].mxu0 }
 0x383   :  { %v797_v8 = vpop.f32.mrb[4].mxu0 }
 0x384   :  { %v3506_v9 = vpop.f32.mrb[5].mxu0  ;;  %v4230_v3 = vadd.f32 %v797_v8, %v219_v0 }
 0x3bb   :  { %v2681_v14 = vpop.f32.mrb[2].mxu1 }
 0x3bc   :  { %v4231_v15 = vadd.f32 %v4230_v3, %v2681_v14  ;;  %v3770_v17 = vpop.f32.mrb[3].mxu1 }
 0x3be   :  { %v2761_v20 = vmax.f32 %v4231_v15, 0.0 }
 0x3c0   :  { %3813 = vmatmul.mubr.msk.f32.vlgmr.msra.gmra.mrb[8].mxu0 %vm2762_vm8, %v2761_v20 }
 0x3c1   :  { %4181 = vmatpush3.bf16.msra.mxu0 %v4180_v21  ;;  %3837 = vmatprep.mubr.msk.f32.mxu0 %vm4329_vm5, %v4330_v10 }
 0x3c2   :  { %4182 = vmatprep.subr.bf16.mxu0 %v4327_v62 }
 0x3c3   :  { %v2756_v32 = vpop.f32.mrb[0].mxu1 }
 0x3c4   :  { %v4233_v25 = vadd.f32 %v4232_v4, %v2756_v32  ;;  %v3781_v13 = vpop.f32.mrb[1].mxu1 }
 0x3c5   :  { %4184 = vmatpush3.bf16.msra.mxu0 %v4183_v24 }
 0x3c6   :  { %4185 = vmatprep.subr.bf16.mxu0 %v4327_v62  ;;  %v2917_v18 = vmax.f32 %v4233_v25, 0.0 }
 0x3c9   :  { %4187 = vmatpush3.bf16.msra.mxu0 %v4186_v26 }
 0x3ca   :  { %4188 = vmatprep.subr.bf16.mxu0 %v4327_v62 }
 0x3cd   :  { %4190 = vmatpush3.bf16.msra.mxu0 %v4189_v29 }
 0x3ce   :  { %4191 = vmatprep.subr.bf16.mxu0 %v4327_v62 }
 0x3d1   :  { %4193 = vmatpush3.bf16.msra.mxu0 %v4192_v16 }
 0x3d2   :  { %3835 = vmatprep.subr.mxu0 %v4330_v10 }
 0x3d5   :  { %3836 = vmatpush3.msk.msra.mxu0 %vm2841_vm9, %v246_v34 }
 0x3d6   :  { %4194 = vmatprep.subr.bf16.mxu0 %v4327_v62 }
 0x493   :  { %v2832_v36 = vpop.f32.mrb[8].mxu0 }
 0x494   :  { %v2833_v37 = vadd.f32 %v2832_v36, %v235_v35  ;;  %v3814_v38 = vpop.f32.mrb[9].mxu0 }
 0x496   :  { %v2836_v39 = vmax.f32 %v2833_v37, 0.0 }
 0x498   :  { %3838 = vmatmul.mubr.msk.f32.vlgmr.msra.gmra.mrb[10].mxu0 %vm2837_vm10, %v2836_v39 }
 0x499   :  { %4196 = vmatpush3.bf16.msra.mxu0 %v5059_v45  ;;  %3870 = vmatprep.mubr.msk.f32.mxu0 %vm4329_vm5, %v4330_v10 }
 0x49a   :  { %4197 = vmatprep.subr.bf16.mxu0 %v4327_v62 }
 0x49d   :  { %4199 = vmatpush3.bf16.msra.mxu0 %v5065_v46 }
 0x49e   :  { %4200 = vmatprep.subr.bf16.mxu0 %v4327_v62 }
 0x4a1   :  { %4202 = vmatpush3.bf16.msra.mxu0 %v5075_v49 }
 0x4a2   :  { %4203 = vmatprep.subr.bf16.mxu0 %v4327_v62 }
 0x4a5   :  { %4205 = vmatpush3.bf16.msra.mxu0 %v5085_v52 }
 0x4a6   :  { %4206 = vmatprep.subr.bf16.mxu0 %v4327_v62 }
 0x4a9   :  { %4208 = vmatpush3.bf16.msra.mxu0 %v5095_v55 }
 0x4aa   :  { %4209 = vmatprep.subr.bf16.mxu0 %v4327_v62 }
 0x4ad   :  { %4211 = vmatpush3.bf16.msra.mxu0 %v5105_v58 }
 0x4ae   :  { %4212 = vmatprep.subr.bf16.mxu0 %v4327_v62 }
 0x4b1   :  { %4214 = vmatpush3.bf16.msra.mxu0 %v5116_v61 }
 0x4b2   :  { %3868 = vmatprep.subr.mxu0 %v4330_v10 }
 0x4b5   :  { %3869 = vmatpush3.msra.mxu0 %v5123_v63 }
 0x4b6   :  { %3871 = vmatmul.mubr.msk.f32.vlgmr.msra.gmra.mrb[12].mxu0 %vm2762_vm8, %v2917_v18  ;;  %4215 = vmatprep.subr.bf16.mxu0 %v4327_v62 }
 0x4b7   :  { %4217 = vmatpush3.bf16.msra.mxu0 %v4180_v21  ;;  %3895 = vmatprep.mubr.msk.f32.mxu0 %vm4329_vm5, %v4330_v10 }
 0x4b8   :  { %4218 = vmatprep.subr.bf16.mxu0 %v4327_v62 }
 0x4bb   :  { %4220 = vmatpush3.bf16.msra.mxu0 %v4183_v24 }
 0x4bc   :  { %4221 = vmatprep.subr.bf16.mxu0 %v4327_v62 }
 0x4bf   :  { %4223 = vmatpush3.bf16.msra.mxu0 %v4186_v26 }
 0x4c0   :  { %4224 = vmatprep.subr.bf16.mxu0 %v4327_v62 }
 0x4c3   :  { %4226 = vmatpush3.bf16.msra.mxu0 %v4189_v29 }
 0x4c4   :  { %4227 = vmatprep.subr.bf16.mxu0 %v4327_v62 }
 0x4c7   :  { %4229 = vmatpush3.bf16.msra.mxu0 %v4192_v16 }
 0x4c8   :  { %3893 = vmatprep.subr.mxu0 %v4330_v10 }
 0x4cb   :  { %3894 = vmatpush3.msk.msra.mxu0 %vm2841_vm9, %v246_v34 }
 0x56b   :  { %v2911_v41 = vpop.f32.mrb[10].mxu0 }
 0x56c   :  { %v2912_v42 = vadd.f32 %v2911_v41, %v247_v40  ;;  %v3839_v43 = vpop.f32.mrb[11].mxu0 }
 0x56e   :  { %2916 = vst.msk [vmem:[#allocation2] sm:$0x1] %vm2915_vm11, %v2912_v42 }
 0x589   :  { %v2987_v44 = vpop.f32.mrb[12].mxu0 }
 0x58a   :  { %v2988_v1 = vadd.f32 %v2987_v44, %v235_v35  ;;  %v3872_v19 = vpop.f32.mrb[13].mxu0 }
 0x58c   :  { %v2991_v45 = vmax.f32 %v2988_v1, 0.0 }
 0x58e   :  { %3896 = vmatmul.mubr.msk.f32.vlgmr.msra.gmra.mrb[14].mxu0 %vm2837_vm10, %v2991_v45 }
 0x661   :  { %v3061_v62 = vpop.f32.mrb[14].mxu0 }
 0x662   :  { %v3062_v10 = vadd.f32 %v3061_v62, %v247_v40  ;;  %v3897_v6 = vpop.f32.mrb[15].mxu0 }
 0x664   :  { %3065 = vst.msk [vmem:[#allocation2 + $0x1] sm:$0x1] %vm2915_vm11, %v3062_v10 }
 0x665   :  { %4313 = shalt.err (!%p4310_p4)
}
 0x666   :  { %s4314_s30 = scalar_lea.hbm %s5229_s9, 32 }
 0x667   :  { %p4315_p5 = scmp.ne.s32.totalorder %s5229_s9, %s4314_s30  ;;  %p4318_p6 = scmp.lt.u32.totalorder %s4314_s30, %s5229_s9 }
 0x669   :  { %p4320_p7 = pnand %p4318_p6, %p4315_p5 }
 0x66b   :  { %4323 = shalt.err (!%p4320_p7)
}
 0x66c   :  { %3075 = dma.vmem_to_hbm [thread:$0]  %s3073_s27, 32, %s5229_s9, [#allocation3]  }
 0x66d   :  { %4324 = dma.done.wait [#allocation3], 32  }
 0x66e   :  { %4325 = vsyncadd [#allocation3], 4294967264 }
 0x66f   :  { %3079 = vsyncpa [#allocation3], 1 }

</bundles_post_ra>
